<compile_context>
chip_gen: v7x
topology: tpu7x:2x2x1
jax: 0.10.0
libtpu: 0.0.40
codegen_flags: <defaults>
</compile_context>

<pallas_src>
import functools
import math

import jax
import jax.numpy as jnp
from jax.experimental import pallas as pl
from jax.experimental.pallas import tpu as pltpu

_F32 = jnp.float32
_LN_EPS = 1e-5


# ----------------------------------------------------------------------------
# Kernel
# ----------------------------------------------------------------------------
def _perceiver_attn_kernel(x_ref, lat_ref, g1_ref, b1_ref, g2_ref, b2_ref,
                           wq_ref, wk_ref, wv_ref, wout_ref, o_ref,
                           q_scr, m_scr, l_scr, acc_scr,
                           *, heads, dim_head, approx_recip):
    cdtype = x_ref.dtype                      # MXU operand dtype (bf16 in prod)
    bt, tile_n1, d = x_ref.shape
    _, n2, _ = lat_ref.shape
    inner = heads * dim_head
    bh = bt * heads
    k_idx = pl.program_id(1)

    def layernorm(t, g, b):
        # Stats in f32 (cheap, required for bf16 inputs); result back in the
        # compute dtype so the MXU sees bf16 operands in production.
        t = t.astype(_F32)
        mu = jnp.mean(t, axis=-1, keepdims=True)
        var = jnp.mean(jnp.square(t - mu), axis=-1, keepdims=True)
        return ((t - mu) * jax.lax.rsqrt(var + _LN_EPS) * g + b).astype(cdtype)

    def to_heads(t, length):
        # (bt*length, heads*dim_head) -> (bt*heads, length, dim_head)
        t = t.reshape(bt, length, heads, dim_head)
        return jnp.transpose(t, (0, 2, 1, 3)).reshape(bh, length, dim_head)

    @pl.when(k_idx == 0)
    def _init():
        # Latents side: LN, q projection (resident in scratch across all n1
        # tiles), and the latent keys/values as the first softmax block.
        # dim_head**-0.25 is already folded into Wq / Wk on the host.
        latn = layernorm(lat_ref[...], g2_ref[...], b2_ref[...]).reshape(bt * n2, d)
        q = jnp.dot(latn, wq_ref[...], preferred_element_type=_F32).astype(cdtype)
        k_l = jnp.dot(latn, wk_ref[...], preferred_element_type=_F32).astype(cdtype)
        v_l = jnp.dot(latn, wv_ref[...], preferred_element_type=_F32).astype(cdtype)
        qh = to_heads(q, n2)
        q_scr[...] = qh
        s = jnp.einsum("hqd,hkd->hqk", qh, to_heads(k_l, n2),
                       preferred_element_type=_F32)
        m = jnp.max(s, axis=-1, keepdims=True)
        p = jnp.exp(s - m)
        m_scr[...] = m
        l_scr[...] = jnp.sum(p, axis=-1, keepdims=True)
        acc_scr[...] = jnp.einsum("hqk,hkd->hqd", p.astype(cdtype),
                                  to_heads(v_l, n2),
                                  preferred_element_type=_F32)

    # Every grid step: one n1 tile of image-feature keys/values, online-softmax
    # accumulator update (exact softmax once all tiles have been folded in).
    xn = layernorm(x_ref[...], g1_ref[...], b1_ref[...]).reshape(bt * tile_n1, d)
    k_x = jnp.dot(xn, wk_ref[...], preferred_element_type=_F32).astype(cdtype)
    v_x = jnp.dot(xn, wv_ref[...], preferred_element_type=_F32).astype(cdtype)
    s = jnp.einsum("hqd,hkd->hqk", q_scr[...], to_heads(k_x, tile_n1),
                   preferred_element_type=_F32)
    m_prev = m_scr[...]
    m_new = jnp.maximum(m_prev, jnp.max(s, axis=-1, keepdims=True))
    alpha = jnp.exp(m_prev - m_new)
    p = jnp.exp(s - m_new)
    l_scr[...] = alpha * l_scr[...] + jnp.sum(p, axis=-1, keepdims=True)
    acc_scr[...] = alpha * acc_scr[...] + jnp.einsum(
        "hqk,hkd->hqd", p.astype(cdtype), to_heads(v_x, tile_n1),
        preferred_element_type=_F32)
    m_scr[...] = m_new

    @pl.when(k_idx == pl.num_programs(1) - 1)
    def _finalize():
        # Normalise after the PV matmuls (touches (bh, n2, dim_head) only),
        # merge heads and apply the output projection.
        o = acc_scr[...] * pl.reciprocal(l_scr[...], approx=approx_recip)
        o = jnp.transpose(o.reshape(bt, heads, n2, dim_head), (0, 2, 1, 3))
        o = o.reshape(bt * n2, inner).astype(cdtype)
        out = jnp.dot(o, wout_ref[...], preferred_element_type=_F32)
        o_ref[...] = out.reshape(bt, n2, d).astype(o_ref.dtype)


# ----------------------------------------------------------------------------
# VMEM byte model + tile selection
# ----------------------------------------------------------------------------
def _pad_up(v, m):
    return -(-v // m) * m


def _tile_bytes(shape, itemsize):
    """Rough VMEM footprint with (8, 128) lane/sublane padding."""
    if len(shape) == 0:
        return itemsize
    if len(shape) == 1:
        return _pad_up(shape[0], 128) * itemsize
    lead = 1
    for s in shape[:-2]:
        lead *= s
    return lead * _pad_up(shape[-2], 8) * _pad_up(shape[-1], 128) * itemsize


def _estimate_vmem(block_b, tile_n1, n2, d, inner, heads, dim_head,
                   cbytes, obytes):
    f32b = 4
    bh = block_b * heads
    total = 0
    # streamed blocks (double-buffered by the Pallas pipeline)
    total += 2 * _tile_bytes((block_b, tile_n1, d), cbytes)        # x
    total += 2 * _tile_bytes((block_b, n2, d), cbytes)             # latents
    total += 2 * _tile_bytes((block_b, n2, d), obytes)             # out
    # single-buffered weights + LN affine
    total += 3 * _tile_bytes((d, inner), cbytes)                   # Wq, Wk, Wv
    total += _tile_bytes((inner, d), cbytes)                       # Wout
    total += 4 * _tile_bytes((1, d), f32b)
    # persistent scratch
    total += _tile_bytes((bh, n2, dim_head), cbytes)               # q
    total += _tile_bytes((bh, n2, dim_head), f32b)                 # acc
    total += 2 * _tile_bytes((bh, n2, 1), f32b)                    # m, l
    # per-step intermediates (conservatively assumed live together)
    total += _tile_bytes((block_b, tile_n1, d), f32b)              # LN f32 temp
    total += 2 * _tile_bytes((block_b * tile_n1, inner), cbytes)   # k_x, v_x
    total += 2 * _tile_bytes((bh, tile_n1, dim_head), cbytes)      # head relayouts
    total += _tile_bytes((bh, n2, tile_n1), f32b)                  # scores (f32)
    total += _tile_bytes((bh, n2, tile_n1), cbytes)                # probs (cdtype)
    return total


def _vmem_budget():
    """(vmem_limit_bytes to request, byte budget for tile sizing)."""
    try:
        phys = int(pltpu.get_tpu_info().vmem_capacity_bytes)
    except Exception:
        phys = 64 * 1024 * 1024        # conservative fallback (v7x-sized VMEM)
    # leave headroom for compiler-internal scratch; never request full physical
    limit = max(phys - 16 * 1024 * 1024, int(phys * 0.75))
    budget = int(limit * 0.8)          # ~20% headroom inside the requested cap
    return limit, budget


def _choose_tiling(b, n1, n2, d, inner, heads, dim_head, cbytes, obytes,
                   budget):
    # tile_n1 must be a multiple of 8 (sublane tiling) or n1 itself, and must
    # divide n1 (no ragged/masked last tile).
    n1_tiles = [t for t in range(8, n1 + 1, 8) if n1 % t == 0]
    if n1 not in n1_tiles:
        n1_tiles.append(n1)
    # keep >= 2 batch-grid steps whenever b >= 2 (v7x: 2 TensorCores)
    max_bb = max(1, -(-b // 2)) if b >= 2 else 1
    bb_cands = sorted({min(max_bb, 1 << i) for i in range(16)} | {max_bb})
    best = None
    for t in n1_tiles:
        for bb in bb_cands:
            est = _estimate_vmem(bb, t, n2, d, inner, heads, dim_head,
                                 cbytes, obytes)
            if est > budget:
                continue
            key = (bb * t, t)          # maximise per-step rows, prefer big tiles
            if best is None or key > best[0]:
                best = (key, bb, t)
    if best is None:
        # Even the smallest config exceeds the model's budget; run best-effort.
        return 1, min(n1_tiles)
    return best[1], best[2]


# ----------------------------------------------------------------------------
# pallas_call construction
# ----------------------------------------------------------------------------
def _const_spec(shape, single_buffer):
    index_map = lambda i, k: (0,) * len(shape)
    if single_buffer and hasattr(pl, "Buffered"):
        try:
            return pl.BlockSpec(shape, index_map, pipeline_mode=pl.Buffered(1))
        except TypeError:              # jax build without pipeline_mode kwarg
            pass
    return pl.BlockSpec(shape, index_map)


def _build_call(bp, n1, n2, d, inner, block_b, tile_n1, heads, dim_head,
                cdtype, out_dtype, approx_recip, vmem_limit,
                single_buffer_weights):
    kernel = functools.partial(_perceiver_attn_kernel, heads=heads,
                               dim_head=dim_head, approx_recip=approx_recip)
    bh = block_b * heads
    sb = single_buffer_weights
    return pl.pallas_call(
        kernel,
        out_shape=jax.ShapeDtypeStruct((bp, n2, d), out_dtype),
        grid_spec=pltpu.PrefetchScalarGridSpec(
            num_scalar_prefetch=0,
            grid=(bp // block_b, n1 // tile_n1),
            in_specs=[
                pl.BlockSpec((block_b, tile_n1, d), lambda i, k: (i, k, 0)),  # x
                pl.BlockSpec((block_b, n2, d), lambda i, k: (i, 0, 0)),  # latents
                _const_spec((1, d), sb),          # norm1 gamma (f32)
                _const_spec((1, d), sb),          # norm1 beta
                _const_spec((1, d), sb),          # norm2 gamma
                _const_spec((1, d), sb),          # norm2 beta
                _const_spec((d, inner), sb),      # Wq^T (scale folded in)
                _const_spec((d, inner), sb),      # Wk^T (scale folded in)
                _const_spec((d, inner), sb),      # Wv^T
                _const_spec((inner, d), sb),      # Wout^T
            ],
            out_specs=pl.BlockSpec((block_b, n2, d), lambda i, k: (i, 0, 0)),
            scratch_shapes=[
                pltpu.VMEM((bh, n2, dim_head), cdtype),       # q (head-major)
                pltpu.VMEM((bh, n2, 1), jnp.float32),         # running max
                pltpu.VMEM((bh, n2, 1), jnp.float32),         # running denom
                pltpu.VMEM((bh, n2, dim_head), jnp.float32),  # output accumulator
            ],
        ),
        compiler_params=pltpu.CompilerParams(
            dimension_semantics=("parallel", "arbitrary"),
            vmem_limit_bytes=int(vmem_limit),
        ),
    )


# ----------------------------------------------------------------------------
# Public wrapper
# ----------------------------------------------------------------------------
def perceiver_attention(x, latents, params, *, heads, dim_head,
                        block_b=None, tile_n1=None):
    """x: (b, n1, D) image features, latents: (b, n2, D) -> (b, n2, D)."""
    b, n1, d = x.shape
    _, n2, _ = latents.shape
    inner = heads * dim_head
    cdtype = x.dtype
    out_dtype = latents.dtype
    cbytes = jnp.dtype(cdtype).itemsize
    obytes = jnp.dtype(out_dtype).itemsize
    scale = 1.0 / math.sqrt(math.sqrt(dim_head))          # dim_head ** -0.25

    vmem_limit, budget = _vmem_budget()
    auto_bb, auto_t = _choose_tiling(b, n1, n2, d, inner, heads, dim_head,
                                     cbytes, obytes, budget)
    block_b = auto_bb if block_b is None else block_b
    tile_n1 = auto_t if tile_n1 is None else tile_n1

    # PyTorch Linear stores (out, in); forward is x @ W.T -> pre-transpose,
    # split to_kv into K / V halves and fold the q/k scale into the weights on
    # the host.  Matmul weights stay in the compute dtype (bf16 in prod).
    wq_t = (params["wq"].T.astype(_F32) * scale).astype(cdtype)   # (D, inner)
    wkv_t = params["wkv"].T.astype(_F32)                          # (D, 2*inner)
    wk_t = (wkv_t[:, :inner] * scale).astype(cdtype)
    wv_t = wkv_t[:, inner:].astype(cdtype)
    wout_t = params["wout"].T.astype(cdtype)                      # (inner, D)
    g1 = params["g1"].reshape(1, d).astype(_F32)
    b1 = params["b1"].reshape(1, d).astype(_F32)
    g2 = params["g2"].reshape(1, d).astype(_F32)
    b2 = params["b2"].reshape(1, d).astype(_F32)

    # Pad the batch up to a multiple of block_b (LayerNorm of a zero row is
    # finite, so the padded rows are harmless) and slice the output back.
    bp = -(-b // block_b) * block_b
    if bp != b:
        pad = [(0, bp - b), (0, 0), (0, 0)]
        xp, latp = jnp.pad(x, pad), jnp.pad(latents, pad)
    else:
        xp, latp = x, latents

    approx_recip = cdtype != jnp.float32    # EUP approx reciprocal on bf16 path
    args = (xp, latp, g1, b1, g2, b2, wq_t, wk_t, wv_t, wout_t)
    try:
        out = _build_call(bp, n1, n2, d, inner, block_b, tile_n1, heads,
                          dim_head, cdtype, out_dtype, approx_recip,
                          vmem_limit, True)(*args)
    except Exception as e:  # narrow: only the Buffered(1)-unsupported case
        msg = str(e)
        if not any(t in msg for t in ("Buffered", "buffer_count",
                                      "pipeline_mode")):
            raise
        out = _build_call(bp, n1, n2, d, inner, block_b, tile_n1, heads,
                          dim_head, cdtype, out_dtype, approx_recip,
                          vmem_limit, False)(*args)
    return out[:b] if bp != b else out


# ----------------------------------------------------------------------------
# Pure-JAX reference (mirrors the PyTorch forward)
# ----------------------------------------------------------------------------
def perceiver_attention_ref(x, latents, params, *, heads, dim_head):
    dtype = x.dtype
    eps = 1e-5

    def ln(t, g, b):
        t32 = t.astype(_F32)
        mu = t32.mean(-1, keepdims=True)
        var = ((t32 - mu) ** 2).mean(-1, keepdims=True)
        return ((t32 - mu) / jnp.sqrt(var + eps) * g + b).astype(dtype)

    g1 = params["g1"].astype(_F32); b1 = params["b1"].astype(_F32)
    g2 = params["g2"].astype(_F32); b2 = params["b2"].astype(_F32)
    wq = params["wq"].astype(dtype)
    wkv = params["wkv"].astype(dtype)
    wout = params["wout"].astype(dtype)

    xn = ln(x, g1, b1)
    latn = ln(latents, g2, b2)
    q = latn @ wq.T
    kv = jnp.concatenate([xn, latn], axis=1) @ wkv.T
    k, v = jnp.split(kv, 2, axis=-1)

    def rs(t):
        b_, l_, _ = t.shape
        return t.reshape(b_, l_, heads, -1).transpose(0, 2, 1, 3)

    qh, kh, vh = rs(q), rs(k), rs(v)
    scale = 1.0 / math.sqrt(math.sqrt(dim_head))
    w = jnp.einsum("bhqd,bhkd->bhqk", qh * scale, kh * scale)
    w = jax.nn.softmax(w.astype(_F32), axis=-1).astype(w.dtype)
    o = jnp.einsum("bhqk,bhkd->bhqd", w, vh)
    o = o.transpose(0, 2, 1, 3).reshape(x.shape[0], latents.shape[1], -1)
    return o @ wout.T


# ----------------------------------------------------------------------------
# Demo / self-test
# ----------------------------------------------------------------------------
if __name__ == "__main__":
    B, N1, N2, D = 2, 16, 8, 32
    HEADS, DIM_HEAD = 4, 8
    INNER = HEADS * DIM_HEAD

    key = jax.random.PRNGKey(0)
    kx, kl, kq, kkv, kout, kg1, kb1, kg2, kb2, kx3, kl3 = jax.random.split(key, 11)

    x = jax.random.normal(kx, (B, N1, D), dtype=jnp.float32)
    latents = jax.random.normal(kl, (B, N2, D), dtype=jnp.float32)

    params = {
        # nn.Linear weights: (out_features, in_features)
        "wq": jax.random.normal(kq, (INNER, D), dtype=jnp.float32) * 0.05,
        "wkv": jax.random.normal(kkv, (2 * INNER, D), dtype=jnp.float32) * 0.05,
        "wout": jax.random.normal(kout, (D, INNER), dtype=jnp.float32) * 0.05,
        # nn.LayerNorm affine params (perturbed so they matter in the test)
        "g1": 1.0 + 0.1 * jax.random.normal(kg1, (D,), dtype=jnp.float32),
        "b1": 0.1 * jax.random.normal(kb1, (D,), dtype=jnp.float32),
        "g2": 1.0 + 0.1 * jax.random.normal(kg2, (D,), dtype=jnp.float32),
        "b2": 0.1 * jax.random.normal(kb2, (D,), dtype=jnp.float32),
    }

    # float32 path — tight check against the pure-JAX reference.
    out = perceiver_attention(x, latents, params, heads=HEADS, dim_head=DIM_HEAD)
    out = jax.block_until_ready(out)
    ref = perceiver_attention_ref(x, latents, params, heads=HEADS, dim_head=DIM_HEAD)
    assert out.shape == (B, N2, D), out.shape
    assert jnp.allclose(out, ref, atol=1e-3, rtol=1e-3), \
        float(jnp.max(jnp.abs(out - ref)))

    # bfloat16 path — production dtype (bf16 MXU operands, f32 LN/softmax,
    # approx reciprocal on the EUP).
    xb = x.astype(jnp.bfloat16)
    lb = latents.astype(jnp.bfloat16)
    out_bf = perceiver_attention(xb, lb, params, heads=HEADS, dim_head=DIM_HEAD)
    out_bf = jax.block_until_ready(out_bf)
    ref_bf = perceiver_attention_ref(xb, lb, params, heads=HEADS, dim_head=DIM_HEAD)
    err = float(jnp.max(jnp.abs(out_bf.astype(jnp.float32)
                                - ref_bf.astype(jnp.float32))))
    assert out_bf.dtype == jnp.bfloat16 and out_bf.shape == (B, N2, D)
    assert err < 5e-2, err

    # Odd batch — exercises batch padding + the >=2-step parallel batch grid.
    x3 = jax.random.normal(kx3, (3, N1, D), dtype=jnp.float32)
    l3 = jax.random.normal(kl3, (3, N2, D), dtype=jnp.float32)
    out3 = perceiver_attention(x3, l3, params, heads=HEADS, dim_head=DIM_HEAD)
    out3 = jax.block_until_ready(out3)
    ref3 = perceiver_attention_ref(x3, l3, params, heads=HEADS, dim_head=DIM_HEAD)
    assert out3.shape == (3, N2, D), out3.shape
    assert jnp.allclose(out3, ref3, atol=1e-3, rtol=1e-3), \
        float(jnp.max(jnp.abs(out3 - ref3)))

    print("KERNEL_OK")
</pallas_src>

<mosaic_0001>
module attributes {stable_mosaic.version = 11 : i64} {
  func.func @_perceiver_attn_kernel(%arg0: i32, %arg1: i32, %arg2: memref<1x16x32xf32, #tpu.memory_space<vmem>>, %arg3: memref<1x8x32xf32, #tpu.memory_space<vmem>>, %arg4: memref<1x32xf32, #tpu.memory_space<vmem>>, %arg5: memref<1x32xf32, #tpu.memory_space<vmem>>, %arg6: memref<1x32xf32, #tpu.memory_space<vmem>>, %arg7: memref<1x32xf32, #tpu.memory_space<vmem>>, %arg8: memref<32x32xf32, #tpu.memory_space<vmem>>, %arg9: memref<32x32xf32, #tpu.memory_space<vmem>>, %arg10: memref<32x32xf32, #tpu.memory_space<vmem>>, %arg11: memref<32x32xf32, #tpu.memory_space<vmem>>, %arg12: memref<1x8x32xf32, #tpu.memory_space<vmem>>, %arg13: memref<4x8x8xf32, #tpu.memory_space<vmem>>, %arg14: memref<4x8x1xf32, #tpu.memory_space<vmem>>, %arg15: memref<4x8x1xf32, #tpu.memory_space<vmem>>, %arg16: memref<4x8x8xf32, #tpu.memory_space<vmem>>) attributes {dimension_semantics = [#tpu.dimension_semantics<parallel>, #tpu.dimension_semantics<arbitrary>], iteration_bounds = array<i64: 2, 1>, scalar_prefetch = 0 : i64, scratch_operands = 4 : i64, tpu.core_type = #tpu.core_type<tc>, window_params = [{transform_indices = @transform_0, window_bounds = array<i64: 1, 16, 32>}, {transform_indices = @transform_1, window_bounds = array<i64: 1, 8, 32>}, {pipeline_mode = #tpu.pipeline_mode<synchronous>, transform_indices = @transform_2, window_bounds = array<i64: 1, 32>}, {pipeline_mode = #tpu.pipeline_mode<synchronous>, transform_indices = @transform_3, window_bounds = array<i64: 1, 32>}, {pipeline_mode = #tpu.pipeline_mode<synchronous>, transform_indices = @transform_4, window_bounds = array<i64: 1, 32>}, {pipeline_mode = #tpu.pipeline_mode<synchronous>, transform_indices = @transform_5, window_bounds = array<i64: 1, 32>}, {pipeline_mode = #tpu.pipeline_mode<synchronous>, transform_indices = @transform_6, window_bounds = array<i64: 32, 32>}, {pipeline_mode = #tpu.pipeline_mode<synchronous>, transform_indices = @transform_7, window_bounds = array<i64: 32, 32>}, {pipeline_mode = #tpu.pipeline_mode<synchronous>, transform_indices = @transform_8, window_bounds = array<i64: 32, 32>}, {pipeline_mode = #tpu.pipeline_mode<synchronous>, transform_indices = @transform_9, window_bounds = array<i64: 32, 32>}, {transform_indices = @transform_10, window_bounds = array<i64: 1, 8, 32>}]} {
    %c0_i32 = arith.constant 0 : i32
    %0 = arith.cmpi eq, %arg1, %c0_i32 : i32
    %1 = arith.extui %0 : i1 to i32
    %c0_i32_0 = arith.constant 0 : i32
    %2 = arith.cmpi ne, %1, %c0_i32_0 : i32
    scf.if %2 {
      %c0_44 = arith.constant 0 : index
      %c0_45 = arith.constant 0 : index
      %c0_46 = arith.constant 0 : index
      %68 = vector.load %arg3[%c0_44, %c0_45, %c0_46] : memref<1x8x32xf32, #tpu.memory_space<vmem>>, vector<1x8x32xf32>
      %c0_47 = arith.constant 0 : index
      %c0_48 = arith.constant 0 : index
      %69 = vector.load %arg6[%c0_47, %c0_48] : memref<1x32xf32, #tpu.memory_space<vmem>>, vector<1x32xf32>
      %c0_49 = arith.constant 0 : index
      %c0_50 = arith.constant 0 : index
      %70 = vector.load %arg7[%c0_49, %c0_50] : memref<1x32xf32, #tpu.memory_space<vmem>>, vector<1x32xf32>
      %cst_51 = arith.constant dense<0.000000e+00> : vector<1x8xf32>
      %71 = vector.multi_reduction <add>, %68, %cst_51 [2] : vector<1x8x32xf32> to vector<1x8xf32>
      %72 = vector.shape_cast %71 : vector<1x8xf32> to vector<1x8x1xf32>
      %cst_52 = arith.constant 3.200000e+01 : f32
      %73 = vector.broadcast %cst_52 : f32 to vector<1x8x1xf32>
      %74 = arith.divf %72, %73 : vector<1x8x1xf32>
      %75 = vector.broadcast %74 : vector<1x8x1xf32> to vector<1x8x32xf32>
      %76 = arith.subf %68, %75 : vector<1x8x32xf32>
      %77 = arith.mulf %76, %76 : vector<1x8x32xf32>
      %cst_53 = arith.constant dense<0.000000e+00> : vector<1x8xf32>
      %78 = vector.multi_reduction <add>, %77, %cst_53 [2] : vector<1x8x32xf32> to vector<1x8xf32>
      %79 = vector.shape_cast %78 : vector<1x8xf32> to vector<1x8x1xf32>
      %cst_54 = arith.constant 3.200000e+01 : f32
      %80 = vector.broadcast %cst_54 : f32 to vector<1x8x1xf32>
      %81 = arith.divf %79, %80 : vector<1x8x1xf32>
      %82 = vector.broadcast %74 : vector<1x8x1xf32> to vector<1x8x32xf32>
      %83 = arith.subf %68, %82 : vector<1x8x32xf32>
      %cst_55 = arith.constant 9.99999974E-6 : f32
      %84 = vector.broadcast %cst_55 : f32 to vector<1x8x1xf32>
      %85 = arith.addf %81, %84 : vector<1x8x1xf32>
      %86 = math.rsqrt %85 : vector<1x8x1xf32>
      %87 = vector.broadcast %86 : vector<1x8x1xf32> to vector<1x8x32xf32>
      %88 = arith.mulf %83, %87 : vector<1x8x32xf32>
      %89 = vector.shape_cast %69 : vector<1x32xf32> to vector<1x1x32xf32>
      %90 = vector.broadcast %89 : vector<1x1x32xf32> to vector<1x8x32xf32>
      %91 = arith.mulf %88, %90 : vector<1x8x32xf32>
      %92 = vector.shape_cast %70 : vector<1x32xf32> to vector<1x1x32xf32>
      %93 = vector.broadcast %92 : vector<1x1x32xf32> to vector<1x8x32xf32>
      %94 = arith.addf %91, %93 : vector<1x8x32xf32>
      %95 = vector.shape_cast %94 : vector<1x8x32xf32> to vector<8x32xf32>
      %c0_56 = arith.constant 0 : index
      %c0_57 = arith.constant 0 : index
      %96 = vector.load %arg8[%c0_56, %c0_57] : memref<32x32xf32, #tpu.memory_space<vmem>>, vector<32x32xf32>
      %cst_58 = arith.constant dense<0.000000e+00> : vector<8x32xf32>
      %97 = tpu.matmul %95, %96, %cst_58 {dimension_numbers = #tpu.dot_dimension_numbers<[1], [0], [0], [1], [0, 0, 1, 1], [], []>} : vector<8x32xf32>, vector<32x32xf32>, vector<8x32xf32> -> vector<8x32xf32>
      %c0_59 = arith.constant 0 : index
      %c0_60 = arith.constant 0 : index
      %98 = vector.load %arg9[%c0_59, %c0_60] : memref<32x32xf32, #tpu.memory_space<vmem>>, vector<32x32xf32>
      %cst_61 = arith.constant dense<0.000000e+00> : vector<8x32xf32>
      %99 = tpu.matmul %95, %98, %cst_61 {dimension_numbers = #tpu.dot_dimension_numbers<[1], [0], [0], [1], [0, 0, 1, 1], [], []>} : vector<8x32xf32>, vector<32x32xf32>, vector<8x32xf32> -> vector<8x32xf32>
      %c0_62 = arith.constant 0 : index
      %c0_63 = arith.constant 0 : index
      %100 = vector.load %arg10[%c0_62, %c0_63] : memref<32x32xf32, #tpu.memory_space<vmem>>, vector<32x32xf32>
      %cst_64 = arith.constant dense<0.000000e+00> : vector<8x32xf32>
      %101 = tpu.matmul %95, %100, %cst_64 {dimension_numbers = #tpu.dot_dimension_numbers<[1], [0], [0], [1], [0, 0, 1, 1], [], []>} : vector<8x32xf32>, vector<32x32xf32>, vector<8x32xf32> -> vector<8x32xf32>
      %102 = vector.shape_cast %97 : vector<8x32xf32> to vector<1x8x4x8xf32>
      %103 = tpu.transpose %102, [0, 2, 1, 3] : vector<1x8x4x8xf32> -> vector<1x4x8x8xf32>
      %104 = vector.shape_cast %103 : vector<1x4x8x8xf32> to vector<4x8x8xf32>
      %c0_65 = arith.constant 0 : index
      %c0_66 = arith.constant 0 : index
      %c0_67 = arith.constant 0 : index
      %105 = vector.load %arg13[%c0_65, %c0_66, %c0_67] : memref<4x8x8xf32, #tpu.memory_space<vmem>>, vector<4x8x8xf32>
      tpu.vector_store %arg13[%c0_65, %c0_66, %c0_67], %104 {strides = array<i32>} : memref<4x8x8xf32, #tpu.memory_space<vmem>>, vector<4x8x8xf32>,
      %106 = vector.shape_cast %99 : vector<8x32xf32> to vector<1x8x4x8xf32>
      %107 = tpu.transpose %106, [0, 2, 1, 3] : vector<1x8x4x8xf32> -> vector<1x4x8x8xf32>
      %108 = vector.shape_cast %107 : vector<1x4x8x8xf32> to vector<4x8x8xf32>
      "tpu.trace_start"() <{level = 10 : i32, message = "hqd,hkd->hqk"}> : () -> ()
      %cst_68 = arith.constant dense<0.000000e+00> : vector<4x8x8xf32>
      %109 = tpu.matmul %104, %108, %cst_68 {dimension_numbers = #tpu.dot_dimension_numbers<[2], [2], [1], [1], [0, 0, 0, 1, 1, 1], [0], [0]>} : vector<4x8x8xf32>, vector<4x8x8xf32>, vector<4x8x8xf32> -> vector<4x8x8xf32>
      "tpu.trace_stop"() : () -> ()
      %cst_69 = arith.constant dense<0xFF800000> : vector<4x8xf32>
      %110 = vector.multi_reduction <maximumf>, %109, %cst_69 [2] : vector<4x8x8xf32> to vector<4x8xf32>
      %111 = vector.shape_cast %110 : vector<4x8xf32> to vector<4x8x1xf32>
      %112 = vector.broadcast %111 : vector<4x8x1xf32> to vector<4x8x8xf32>
      %113 = arith.subf %109, %112 : vector<4x8x8xf32>
      %114 = math.exp %113 : vector<4x8x8xf32>
      %c0_70 = arith.constant 0 : index
      %c0_71 = arith.constant 0 : index
      %c0_72 = arith.constant 0 : index
      %115 = vector.load %arg14[%c0_70, %c0_71, %c0_72] : memref<4x8x1xf32, #tpu.memory_space<vmem>>, vector<4x8x1xf32>
      tpu.vector_store %arg14[%c0_70, %c0_71, %c0_72], %111 {strides = array<i32>} : memref<4x8x1xf32, #tpu.memory_space<vmem>>, vector<4x8x1xf32>,
      %cst_73 = arith.constant dense<0.000000e+00> : vector<4x8xf32>
      %116 = vector.multi_reduction <add>, %114, %cst_73 [2] : vector<4x8x8xf32> to vector<4x8xf32>
      %117 = vector.shape_cast %116 : vector<4x8xf32> to vector<4x8x1xf32>
      %c0_74 = arith.constant 0 : index
      %c0_75 = arith.constant 0 : index
      %c0_76 = arith.constant 0 : index
      %118 = vector.load %arg15[%c0_74, %c0_75, %c0_76] : memref<4x8x1xf32, #tpu.memory_space<vmem>>, vector<4x8x1xf32>
      tpu.vector_store %arg15[%c0_74, %c0_75, %c0_76], %117 {strides = array<i32>} : memref<4x8x1xf32, #tpu.memory_space<vmem>>, vector<4x8x1xf32>,
      %119 = vector.shape_cast %101 : vector<8x32xf32> to vector<1x8x4x8xf32>
      %120 = tpu.transpose %119, [0, 2, 1, 3] : vector<1x8x4x8xf32> -> vector<1x4x8x8xf32>
      %121 = vector.shape_cast %120 : vector<1x4x8x8xf32> to vector<4x8x8xf32>
      "tpu.trace_start"() <{level = 10 : i32, message = "hqk,hkd->hqd"}> : () -> ()
      %cst_77 = arith.constant dense<0.000000e+00> : vector<4x8x8xf32>
      %122 = tpu.matmul %114, %121, %cst_77 {dimension_numbers = #tpu.dot_dimension_numbers<[2], [1], [1], [2], [0, 0, 0, 1, 1, 2], [0], [0]>} : vector<4x8x8xf32>, vector<4x8x8xf32>, vector<4x8x8xf32> -> vector<4x8x8xf32>
      "tpu.trace_stop"() : () -> ()
      %c0_78 = arith.constant 0 : index
      %c0_79 = arith.constant 0 : index
      %c0_80 = arith.constant 0 : index
      %123 = vector.load %arg16[%c0_78, %c0_79, %c0_80] : memref<4x8x8xf32, #tpu.memory_space<vmem>>, vector<4x8x8xf32>
      tpu.vector_store %arg16[%c0_78, %c0_79, %c0_80], %122 {strides = array<i32>} : memref<4x8x8xf32, #tpu.memory_space<vmem>>, vector<4x8x8xf32>,
    } else {
    }
    %c0 = arith.constant 0 : index
    %c0_1 = arith.constant 0 : index
    %c0_2 = arith.constant 0 : index
    %3 = vector.load %arg2[%c0, %c0_1, %c0_2] : memref<1x16x32xf32, #tpu.memory_space<vmem>>, vector<1x16x32xf32>
    %c0_3 = arith.constant 0 : index
    %c0_4 = arith.constant 0 : index
    %4 = vector.load %arg4[%c0_3, %c0_4] : memref<1x32xf32, #tpu.memory_space<vmem>>, vector<1x32xf32>
    %c0_5 = arith.constant 0 : index
    %c0_6 = arith.constant 0 : index
    %5 = vector.load %arg5[%c0_5, %c0_6] : memref<1x32xf32, #tpu.memory_space<vmem>>, vector<1x32xf32>
    %cst = arith.constant dense<0.000000e+00> : vector<1x16xf32>
    %6 = vector.multi_reduction <add>, %3, %cst [2] : vector<1x16x32xf32> to vector<1x16xf32>
    %7 = vector.shape_cast %6 : vector<1x16xf32> to vector<1x16x1xf32>
    %cst_7 = arith.constant 3.200000e+01 : f32
    %8 = vector.broadcast %cst_7 : f32 to vector<1x16x1xf32>
    %9 = arith.divf %7, %8 : vector<1x16x1xf32>
    %10 = vector.broadcast %9 : vector<1x16x1xf32> to vector<1x16x32xf32>
    %11 = arith.subf %3, %10 : vector<1x16x32xf32>
    %12 = arith.mulf %11, %11 : vector<1x16x32xf32>
    %cst_8 = arith.constant dense<0.000000e+00> : vector<1x16xf32>
    %13 = vector.multi_reduction <add>, %12, %cst_8 [2] : vector<1x16x32xf32> to vector<1x16xf32>
    %14 = vector.shape_cast %13 : vector<1x16xf32> to vector<1x16x1xf32>
    %cst_9 = arith.constant 3.200000e+01 : f32
    %15 = vector.broadcast %cst_9 : f32 to vector<1x16x1xf32>
    %16 = arith.divf %14, %15 : vector<1x16x1xf32>
    %17 = vector.broadcast %9 : vector<1x16x1xf32> to vector<1x16x32xf32>
    %18 = arith.subf %3, %17 : vector<1x16x32xf32>
    %cst_10 = arith.constant 9.99999974E-6 : f32
    %19 = vector.broadcast %cst_10 : f32 to vector<1x16x1xf32>
    %20 = arith.addf %16, %19 : vector<1x16x1xf32>
    %21 = math.rsqrt %20 : vector<1x16x1xf32>
    %22 = vector.broadcast %21 : vector<1x16x1xf32> to vector<1x16x32xf32>
    %23 = arith.mulf %18, %22 : vector<1x16x32xf32>
    %24 = vector.shape_cast %4 : vector<1x32xf32> to vector<1x1x32xf32>
    %25 = vector.broadcast %24 : vector<1x1x32xf32> to vector<1x16x32xf32>
    %26 = arith.mulf %23, %25 : vector<1x16x32xf32>
    %27 = vector.shape_cast %5 : vector<1x32xf32> to vector<1x1x32xf32>
    %28 = vector.broadcast %27 : vector<1x1x32xf32> to vector<1x16x32xf32>
    %29 = arith.addf %26, %28 : vector<1x16x32xf32>
    %30 = vector.shape_cast %29 : vector<1x16x32xf32> to vector<16x32xf32>
    %c0_11 = arith.constant 0 : index
    %c0_12 = arith.constant 0 : index
    %31 = vector.load %arg9[%c0_11, %c0_12] : memref<32x32xf32, #tpu.memory_space<vmem>>, vector<32x32xf32>
    %cst_13 = arith.constant dense<0.000000e+00> : vector<16x32xf32>
    %32 = tpu.matmul %30, %31, %cst_13 {dimension_numbers = #tpu.dot_dimension_numbers<[1], [0], [0], [1], [0, 0, 1, 1], [], []>} : vector<16x32xf32>, vector<32x32xf32>, vector<16x32xf32> -> vector<16x32xf32>
    %c0_14 = arith.constant 0 : index
    %c0_15 = arith.constant 0 : index
    %33 = vector.load %arg10[%c0_14, %c0_15] : memref<32x32xf32, #tpu.memory_space<vmem>>, vector<32x32xf32>
    %cst_16 = arith.constant dense<0.000000e+00> : vector<16x32xf32>
    %34 = tpu.matmul %30, %33, %cst_16 {dimension_numbers = #tpu.dot_dimension_numbers<[1], [0], [0], [1], [0, 0, 1, 1], [], []>} : vector<16x32xf32>, vector<32x32xf32>, vector<16x32xf32> -> vector<16x32xf32>
    %c0_17 = arith.constant 0 : index
    %c0_18 = arith.constant 0 : index
    %c0_19 = arith.constant 0 : index
    %35 = vector.load %arg13[%c0_17, %c0_18, %c0_19] : memref<4x8x8xf32, #tpu.memory_space<vmem>>, vector<4x8x8xf32>
    %36 = vector.shape_cast %32 : vector<16x32xf32> to vector<1x16x4x8xf32>
    %37 = tpu.transpose %36, [0, 2, 1, 3] : vector<1x16x4x8xf32> -> vector<1x4x16x8xf32>
    %38 = vector.shape_cast %37 : vector<1x4x16x8xf32> to vector<4x16x8xf32>
    "tpu.trace_start"() <{level = 10 : i32, message = "hqd,hkd->hqk"}> : () -> ()
    %cst_20 = arith.constant dense<0.000000e+00> : vector<4x8x16xf32>
    %39 = tpu.matmul %35, %38, %cst_20 {dimension_numbers = #tpu.dot_dimension_numbers<[2], [2], [1], [1], [0, 0, 0, 1, 1, 1], [0], [0]>} : vector<4x8x8xf32>, vector<4x16x8xf32>, vector<4x8x16xf32> -> vector<4x8x16xf32>
    "tpu.trace_stop"() : () -> ()
    %c0_21 = arith.constant 0 : index
    %c0_22 = arith.constant 0 : index
    %c0_23 = arith.constant 0 : index
    %40 = vector.load %arg14[%c0_21, %c0_22, %c0_23] : memref<4x8x1xf32, #tpu.memory_space<vmem>>, vector<4x8x1xf32>
    %cst_24 = arith.constant dense<0xFF800000> : vector<4x8xf32>
    %41 = vector.multi_reduction <maximumf>, %39, %cst_24 [2] : vector<4x8x16xf32> to vector<4x8xf32>
    %42 = vector.shape_cast %41 : vector<4x8xf32> to vector<4x8x1xf32>
    %43 = arith.maximumf %40, %42 : vector<4x8x1xf32>
    %44 = arith.subf %40, %43 : vector<4x8x1xf32>
    %45 = math.exp %44 : vector<4x8x1xf32>
    %46 = vector.broadcast %43 : vector<4x8x1xf32> to vector<4x8x16xf32>
    %47 = arith.subf %39, %46 : vector<4x8x16xf32>
    %48 = math.exp %47 : vector<4x8x16xf32>
    %c0_25 = arith.constant 0 : index
    %c0_26 = arith.constant 0 : index
    %c0_27 = arith.constant 0 : index
    %49 = vector.load %arg15[%c0_25, %c0_26, %c0_27] : memref<4x8x1xf32, #tpu.memory_space<vmem>>, vector<4x8x1xf32>
    %50 = arith.mulf %45, %49 : vector<4x8x1xf32>
    %cst_28 = arith.constant dense<0.000000e+00> : vector<4x8xf32>
    %51 = vector.multi_reduction <add>, %48, %cst_28 [2] : vector<4x8x16xf32> to vector<4x8xf32>
    %52 = vector.shape_cast %51 : vector<4x8xf32> to vector<4x8x1xf32>
    %53 = arith.addf %50, %52 : vector<4x8x1xf32>
    %c0_29 = arith.constant 0 : index
    %c0_30 = arith.constant 0 : index
    %c0_31 = arith.constant 0 : index
    %54 = vector.load %arg15[%c0_29, %c0_30, %c0_31] : memref<4x8x1xf32, #tpu.memory_space<vmem>>, vector<4x8x1xf32>
    tpu.vector_store %arg15[%c0_29, %c0_30, %c0_31], %53 {strides = array<i32>} : memref<4x8x1xf32, #tpu.memory_space<vmem>>, vector<4x8x1xf32>,
    %c0_32 = arith.constant 0 : index
    %c0_33 = arith.constant 0 : index
    %c0_34 = arith.constant 0 : index
    %55 = vector.load %arg16[%c0_32, %c0_33, %c0_34] : memref<4x8x8xf32, #tpu.memory_space<vmem>>, vector<4x8x8xf32>
    %56 = vector.broadcast %45 : vector<4x8x1xf32> to vector<4x8x8xf32>
    %57 = arith.mulf %56, %55 : vector<4x8x8xf32>
    %58 = vector.shape_cast %34 : vector<16x32xf32> to vector<1x16x4x8xf32>
    %59 = tpu.transpose %58, [0, 2, 1, 3] : vector<1x16x4x8xf32> -> vector<1x4x16x8xf32>
    %60 = vector.shape_cast %59 : vector<1x4x16x8xf32> to vector<4x16x8xf32>
    "tpu.trace_start"() <{level = 10 : i32, message = "hqk,hkd->hqd"}> : () -> ()
    %cst_35 = arith.constant dense<0.000000e+00> : vector<4x8x8xf32>
    %61 = tpu.matmul %48, %60, %cst_35 {dimension_numbers = #tpu.dot_dimension_numbers<[2], [1], [1], [2], [0, 0, 0, 1, 1, 2], [0], [0]>} : vector<4x8x16xf32>, vector<4x16x8xf32>, vector<4x8x8xf32> -> vector<4x8x8xf32>
    "tpu.trace_stop"() : () -> ()
    %62 = arith.addf %57, %61 : vector<4x8x8xf32>
    %c0_36 = arith.constant 0 : index
    %c0_37 = arith.constant 0 : index
    %c0_38 = arith.constant 0 : index
    %63 = vector.load %arg16[%c0_36, %c0_37, %c0_38] : memref<4x8x8xf32, #tpu.memory_space<vmem>>, vector<4x8x8xf32>
    tpu.vector_store %arg16[%c0_36, %c0_37, %c0_38], %62 {strides = array<i32>} : memref<4x8x8xf32, #tpu.memory_space<vmem>>, vector<4x8x8xf32>,
    %c0_39 = arith.constant 0 : index
    %c0_40 = arith.constant 0 : index
    %c0_41 = arith.constant 0 : index
    %64 = vector.load %arg14[%c0_39, %c0_40, %c0_41] : memref<4x8x1xf32, #tpu.memory_space<vmem>>, vector<4x8x1xf32>
    tpu.vector_store %arg14[%c0_39, %c0_40, %c0_41], %43 {strides = array<i32>} : memref<4x8x1xf32, #tpu.memory_space<vmem>>, vector<4x8x1xf32>,
    %c0_i32_42 = arith.constant 0 : i32
    %65 = arith.cmpi eq, %arg1, %c0_i32_42 : i32
    %66 = arith.extui %65 : i1 to i32
    %c0_i32_43 = arith.constant 0 : i32
    %67 = arith.cmpi ne, %66, %c0_i32_43 : i32
    scf.if %67 {
      %c0_44 = arith.constant 0 : index
      %c0_45 = arith.constant 0 : index
      %c0_46 = arith.constant 0 : index
      %68 = vector.load %arg16[%c0_44, %c0_45, %c0_46] : memref<4x8x8xf32, #tpu.memory_space<vmem>>, vector<4x8x8xf32>
      %c0_47 = arith.constant 0 : index
      %c0_48 = arith.constant 0 : index
      %c0_49 = arith.constant 0 : index
      %69 = vector.load %arg15[%c0_47, %c0_48, %c0_49] : memref<4x8x1xf32, #tpu.memory_space<vmem>>, vector<4x8x1xf32>
      %70 = tpu.reciprocal %69 : vector<4x8x1xf32> -> vector<4x8x1xf32>
      %71 = vector.broadcast %70 : vector<4x8x1xf32> to vector<4x8x8xf32>
      %72 = arith.mulf %68, %71 : vector<4x8x8xf32>
      %73 = vector.shape_cast %72 : vector<4x8x8xf32> to vector<1x4x8x8xf32>
      %74 = tpu.transpose %73, [0, 2, 1, 3] : vector<1x4x8x8xf32> -> vector<1x8x4x8xf32>
      %75 = vector.shape_cast %74 : vector<1x8x4x8xf32> to vector<8x32xf32>
      %c0_50 = arith.constant 0 : index
      %c0_51 = arith.constant 0 : index
      %76 = vector.load %arg11[%c0_50, %c0_51] : memref<32x32xf32, #tpu.memory_space<vmem>>, vector<32x32xf32>
      %cst_52 = arith.constant dense<0.000000e+00> : vector<8x32xf32>
      %77 = tpu.matmul %75, %76, %cst_52 {dimension_numbers = #tpu.dot_dimension_numbers<[1], [0], [0], [1], [0, 0, 1, 1], [], []>} : vector<8x32xf32>, vector<32x32xf32>, vector<8x32xf32> -> vector<8x32xf32>
      %78 = vector.shape_cast %77 : vector<8x32xf32> to vector<1x8x32xf32>
      %c0_53 = arith.constant 0 : index
      %c0_54 = arith.constant 0 : index
      %c0_55 = arith.constant 0 : index
      %79 = vector.load %arg12[%c0_53, %c0_54, %c0_55] : memref<1x8x32xf32, #tpu.memory_space<vmem>>, vector<1x8x32xf32>
      tpu.vector_store %arg12[%c0_53, %c0_54, %c0_55], %78 {strides = array<i32>} : memref<1x8x32xf32, #tpu.memory_space<vmem>>, vector<1x8x32xf32>,
    } else {
    }
    return
  }
  func.func @transform_0(%arg0: i32, %arg1: i32) -> (i32, i32, i32) {
    %c0_i32 = arith.constant 0 : i32
    %c0_i32_0 = arith.constant 0 : i32
    return %arg0, %arg1, %c0_i32 : i32, i32, i32
  }
  func.func @transform_1(%arg0: i32, %arg1: i32) -> (i32, i32, i32) {
    %c0_i32 = arith.constant 0 : i32
    %c0_i32_0 = arith.constant 0 : i32
    %c0_i32_1 = arith.constant 0 : i32
    return %arg0, %c0_i32, %c0_i32_0 : i32, i32, i32
  }
  func.func @transform_2(%arg0: i32, %arg1: i32) -> (i32, i32) {
    %c0_i32 = arith.constant 0 : i32
    %c0_i32_0 = arith.constant 0 : i32
    %c0_i32_1 = arith.constant 0 : i32
    return %c0_i32, %c0_i32_0 : i32, i32
  }
  func.func @transform_3(%arg0: i32, %arg1: i32) -> (i32, i32) {
    %c0_i32 = arith.constant 0 : i32
    %c0_i32_0 = arith.constant 0 : i32
    %c0_i32_1 = arith.constant 0 : i32
    return %c0_i32, %c0_i32_0 : i32, i32
  }
  func.func @transform_4(%arg0: i32, %arg1: i32) -> (i32, i32) {
    %c0_i32 = arith.constant 0 : i32
    %c0_i32_0 = arith.constant 0 : i32
    %c0_i32_1 = arith.constant 0 : i32
    return %c0_i32, %c0_i32_0 : i32, i32
  }
  func.func @transform_5(%arg0: i32, %arg1: i32) -> (i32, i32) {
    %c0_i32 = arith.constant 0 : i32
    %c0_i32_0 = arith.constant 0 : i32
    %c0_i32_1 = arith.constant 0 : i32
    return %c0_i32, %c0_i32_0 : i32, i32
  }
  func.func @transform_6(%arg0: i32, %arg1: i32) -> (i32, i32) {
    %c0_i32 = arith.constant 0 : i32
    %c0_i32_0 = arith.constant 0 : i32
    %c0_i32_1 = arith.constant 0 : i32
    return %c0_i32, %c0_i32_0 : i32, i32
  }
  func.func @transform_7(%arg0: i32, %arg1: i32) -> (i32, i32) {
    %c0_i32 = arith.constant 0 : i32
    %c0_i32_0 = arith.constant 0 : i32
    %c0_i32_1 = arith.constant 0 : i32
    return %c0_i32, %c0_i32_0 : i32, i32
  }
  func.func @transform_8(%arg0: i32, %arg1: i32) -> (i32, i32) {
    %c0_i32 = arith.constant 0 : i32
    %c0_i32_0 = arith.constant 0 : i32
    %c0_i32_1 = arith.constant 0 : i32
    return %c0_i32, %c0_i32_0 : i32, i32
  }
  func.func @transform_9(%arg0: i32, %arg1: i32) -> (i32, i32) {
    %c0_i32 = arith.constant 0 : i32
    %c0_i32_0 = arith.constant 0 : i32
    %c0_i32_1 = arith.constant 0 : i32
    return %c0_i32, %c0_i32_0 : i32, i32
  }
  func.func @transform_10(%arg0: i32, %arg1: i32) -> (i32, i32, i32) {
    %c0_i32 = arith.constant 0 : i32
    %c0_i32_0 = arith.constant 0 : i32
    %c0_i32_1 = arith.constant 0 : i32
    return %arg0, %c0_i32, %c0_i32_0 : i32, i32, i32
  }
}

</mosaic_0001>

<bundles_post_ra>
// kernel: tpu_custom_call.1
= control target key start
LH: loop header
LB: loop body
LE: loop exit
PB: predicated region body
PF: predicated region fallthrough
CT: control target
= control target key end

     0   :  { %s5599_s0 = inlined_call_operand.hbm [shape: f32[2,16,32], index: 0, kind: input, shape index: {}]   ;;  %s5600_s1 = inlined_call_operand.hbm [shape: f32[2,8,32], index: 1, kind: input, shape index: {}]   ;;  %s5601_s2 = inlined_call_operand.vmem [shape: f32[1,32], index: 2, kind: input, shape index: {}]   ;;  %s5602_s3 = inlined_call_operand.vmem [shape: f32[1,32], index: 3, kind: input, shape index: {}]   ;;  %s5603_s4 = inlined_call_operand.hbm [shape: f32[1,32], index: 4, kind: input, shape index: {}]   ;;  %s5604_s5 = inlined_call_operand.hbm [shape: f32[1,32], index: 5, kind: input, shape index: {}]   ;;  %s5605_s6 = inlined_call_operand.hbm [shape: f32[32,32], index: 6, kind: input, shape index: {}]   ;;  %s5606_s7 = inlined_call_operand.hbm [shape: f32[32,32], index: 7, kind: input, shape index: {}]   ;;  %s5607_s8 = inlined_call_operand.hbm [shape: f32[32,32], index: 8, kind: input, shape index: {}]   ;;  %s5608_s9 = inlined_call_operand.vmem [shape: f32[32,32], index: 9, kind: input, shape index: {}]   ;;  %s5609_s10 = inlined_call_operand.hbm [shape: f32[2,8,32], index: 10, kind: output, shape index: {}]  }
   0x1   :  { %5618 = sst [smem:[#allocation26_spill]] %s5599_s0 }
   0x2   :  { %5619 = sst [smem:[#allocation27_spill]] %s5602_s3 }
   0x3   :  { %5620 = sst [smem:[#allocation28_spill]] %s5603_s4 }
   0x4   :  { %5621 = sst [smem:[#allocation29_spill]] %s5604_s5 }
   0x5   :  { %5622 = sst [smem:[#allocation30_spill]] %s5605_s6 }
   0x6   :  { %5623 = sst [smem:[#allocation31_spill]] %s5606_s7 }
   0x7   :  { %5624 = sst [smem:[#allocation32_spill]] %s5607_s8 }
   0x8   :  { %5625 = sst [smem:[#allocation33_spill]] %s5608_s9 }
   0x9   :  { %5626 = sst [smem:[#allocation34_spill]] %s5609_s10 }
   0xa   :  { %15 = vsyncpa [#allocation7], 0 }
   0xb   :  { %17 = vsyncpa [#allocation7 + $0x1], 0 }
   0xc   :  { %18 = vsyncpa [#allocation10], 0 }
   0xd   :  { %20 = vsyncpa [#allocation10 + $0x1], 0 }
   0xe   :  { %21 = vsyncpa [#allocation13], 0 }
   0xf   :  { %22 = vsyncpa [#allocation16], 0 }
  0x10   :  { %23 = vsyncpa [#allocation8], 0 }
  0x11   :  { %25 = vsyncpa [#allocation8 + $0x1], 0  ;;  %s4761_s13 = smov 0   ;;  %s4763_s14 = smov 0  }
  0x12   :  { %s4765_s15 = smov 0   ;;  %s4767_s16 = smov 0  }
  0x13   :  { %s4769_s17 = smov 0   ;;  %s4771_s18 = smov 0  }
  0x14 LB: > { %5627 = sst [smem:[#allocation25_spill]] %s4674_s16  ;;  %s4792_s19 = sadd.s32 4294967295, %s4682_s18   ;;  %s4682_s18 = sphi %s4771_s18, %s31_s18   ;;  %s4678_s17 = sphi %s4769_s17, %s5665_s17   ;;  %s4674_s16 = sphi %s4767_s16, %s5664_s16   ;;  %s4670_s15 = sphi %s4765_s15, %s5663_s15   ;;  %s4666_s14 = sphi %s4763_s14, %s5662_s14   ;;  %s4662_s13 = sphi %s4761_s13, %s5661_s13  }
  0x15   : > { %p3828_p0 = scmp.ge.s32.totalorder %s4682_s18, 1  ;;  %p5610_p1 = scmp.eq.s32.totalorder %s4792_s19, 0 }
  0x16   : > { %p296_p2 = scmp.lt.s32.totalorder %s4682_s18, 3  ;;  %s4684_s21 = smov [#allocation11]  }
  0x17   : > { %s315_s22 = sshll.u32 %s4684_s21, 4  ;;  %s4685_s23 = smov [#allocation12]   ;;  %s316_s22 = int_to_ptr.vmem [resolvable:$true] %s315_s22 }
  0x18   : > { %p4797_p3 = pnand %p3828_p0, %p296_p2  ;;  %s326_s24 = sshll.u32 %s4685_s23, 4  ;;  %s4810_s24 = int_to_ptr.vmem [resolvable:$true] %s326_s24 }
  0x19   : > { %s4686_s26 = smov [#allocation15]   ;;  %s5630_s4 = sld [smem:[#allocation28_spill]] }
  0x1a   : > { %s5628_s20 = scalar_select %p4797_p3, 1, 0 }
  0x1b   : > { %p4238_p5 = pneg %p4797_p3  ;;  %s4812_s27 = sshll.u32 %s4686_s26, 4  ;;  %s350_s27 = int_to_ptr.vmem [resolvable:$true] %s4812_s27 }
  0x1d   : > { %p4806_p6 = pnand %p4238_p5, %p5610_p1 }
  0x1f   : > { %s4384_s30 = scalar_lea.hbm %s5630_s4, 16  ;;  %p4822_p8 = pneg %p4806_p6 }
  0x20   : > { %p4385_p7 = scmp.ne.s32.totalorder %s5630_s4, %s4384_s30  ;;  %p4391_p11 = scmp.lt.u32.totalorder %s4384_s30, %s5630_s4 }
  0x22   : > { %p4387_p9 = pnand %p4822_p8, %p4385_p7 }
  0x24   : > { %p4388_p10 = pneg %p4387_p9 }
  0x26   : > { %p4393_p12 = pnand %p4391_p11, %p4388_p10 }
  0x28   : > { %4396 = shalt.err (!%p4393_p12)
}
  0x29   : > { %s4397_s28 = scalar_lea.vmem %s316_s22, 16  ;;  %s4404_s29 = scalar_lea.vmem %s316_s22, 32 }
  0x2a   : > { %p4398_p13 = scmp.ne.s32.totalorder %s316_s22, %s4397_s28  ;;  %p4405_p5 = scmp.lt.s32.totalorder %s316_s22, %s316_s22 }
  0x2b   : > { %p4406_p4 = scmp.lt.s32.totalorder %s4404_s29, %s4397_s28 }
  0x2c   : > { %p4400_p0 = pnand %p4398_p13, %p4822_p8 }
  0x2d   : > { %p4407_p1 = por %p4406_p4, %p4405_p5 }
  0x2e   : > { %p4401_p2 = pneg %p4400_p0 }
  0x30   : > { %p4408_p3 = pnand %p4407_p1, %p4401_p2 }
  0x32   : > { %4411 = shalt.err (!%p4408_p3)
}
  0x33   : > { %4241 = dma.hbm_to_vmem [thread:$0]  (!%p4806_p6), %s5630_s4, 16, %s316_s22, [#allocation10]  }
  0x34   : > { %s5632_s5 = sld [smem:[#allocation29_spill]] }
  0x3a   : > { %s4412_s26 = scalar_lea.hbm %s5632_s5, 16 }
  0x3b   : > { %p4413_p7 = scmp.ne.s32.totalorder %s5632_s5, %s4412_s26  ;;  %p4419_p1 = scmp.lt.u32.totalorder %s4412_s26, %s5632_s5 }
  0x3d   : > { %p4415_p9 = pnand %p4413_p7, %p4822_p8 }
  0x3f   : > { %p4416_p4 = pneg %p4415_p9 }
  0x41   : > { %p4421_p3 = pnand %p4419_p1, %p4416_p4 }
  0x43   : > { %4424 = shalt.err (!%p4421_p3)
}
  0x44   : > { %s4425_s22 = scalar_lea.vmem %s4810_s24, 16  ;;  %s4432_s10 = scalar_lea.vmem %s4810_s24, 32 }
  0x45   : > { %p4426_p10 = scmp.ne.s32.totalorder %s4810_s24, %s4425_s22  ;;  %p4433_p13 = scmp.lt.s32.totalorder %s4810_s24, %s4810_s24 }
  0x46   : > { %p4434_p0 = scmp.lt.s32.totalorder %s4432_s10, %s4425_s22 }
  0x47   : > { %p4428_p11 = pnand %p4426_p10, %p4822_p8 }
  0x48   : > { %p4435_p2 = por %p4434_p0, %p4433_p13 }
  0x49   : > { %p4429_p12 = pneg %p4428_p11 }
  0x4b   : > { %p4436_p5 = pnand %p4435_p2, %p4429_p12 }
  0x4d   : > { %4439 = shalt.err (!%p4436_p5)
}
  0x4e   : > { %4244 = dma.hbm_to_vmem [thread:$0]  (!%p4806_p6), %s5632_s5, 16, %s4810_s24, [#allocation13]  }
  0x4f   : > { %s5633_s7 = sld [smem:[#allocation31_spill]] }
  0x55   : > { %s4440_s23 = scalar_lea.hbm %s5633_s7, 512 }
  0x56   : > { %p4441_p7 = scmp.ne.s32.totalorder %s5633_s7, %s4440_s23  ;;  %p4447_p1 = scmp.lt.u32.totalorder %s4440_s23, %s5633_s7 }
  0x58   : > { %p4443_p9 = pnand %p4441_p7, %p4822_p8 }
  0x5a   : > { %p4444_p4 = pneg %p4443_p9 }
  0x5c   : > { %p4449_p3 = pnand %p4447_p1, %p4444_p4 }
  0x5e   : > { %4452 = shalt.err (!%p4449_p3)
}
  0x5f   : > { %s4453_s10 = scalar_lea.vmem %s350_s27, 512  ;;  %p4461_p13 = scmp.lt.s32.totalorder %s350_s27, %s350_s27 }
  0x60   : > { %p4454_p10 = scmp.ne.s32.totalorder %s350_s27, %s4453_s10  ;;  %p4462_p0 = scmp.lt.s32.totalorder %s4453_s10, %s4453_s10 }
  0x62   : > { %p4456_p11 = pnand %p4454_p10, %p4822_p8  ;;  %p4463_p2 = por %p4462_p0, %p4461_p13 }
  0x64   : > { %p4457_p12 = pneg %p4456_p11 }
  0x66   : > { %p4464_p5 = pnand %p4463_p2, %p4457_p12 }
  0x68   : > { %4467 = shalt.err (!%p4464_p5)
}
  0x69   : > { %s5614_s24 = smov 128   ;;  %s5615_s16 = smov 8  }
  0x6a   : > { %4250 = dma.hbm_to_vmem [thread:$0]  (!%p4806_p6), %s5633_s7, 512, %s350_s27, [#allocation16], %s5614_s24, %s5614_s24, %s5615_s16  }
  0x6b   : > { %s4689_s30 = smov [#allocation14]   ;;  %s4690_s26 = smov [#allocation17]  }
  0x6c   : > { %s336_s23 = sshll.u32 %s4689_s30, 4  ;;  %s362_s28 = sshll.u32 %s4690_s26, 4  ;;  %s337_s23 = int_to_ptr.vmem [resolvable:$true] %s336_s23  ;;  %s363_s28 = int_to_ptr.vmem [resolvable:$true] %s362_s28 }
  0x6d   : > { %s5634_s6 = sld [smem:[#allocation30_spill]] }
  0x73   : > { %s4468_s10 = scalar_lea.hbm %s5634_s6, 512 }
  0x74   : > { %p4469_p7 = scmp.ne.s32.totalorder %s5634_s6, %s4468_s10  ;;  %p4475_p1 = scmp.lt.u32.totalorder %s4468_s10, %s5634_s6 }
  0x76   : > { %p4471_p9 = pnand %p4469_p7, %p4822_p8 }
  0x78   : > { %p4472_p4 = pneg %p4471_p9 }
  0x7a   : > { %p4477_p3 = pnand %p4475_p1, %p4472_p4 }
  0x7c   : > { %4480 = shalt.err (!%p4477_p3)
}
  0x7d   : > { %s4481_s27 = scalar_lea.vmem %s337_s23, 512  ;;  %p4489_p13 = scmp.lt.s32.totalorder %s337_s23, %s337_s23 }
  0x7e   : > { %p4482_p10 = scmp.ne.s32.totalorder %s337_s23, %s4481_s27  ;;  %p4490_p0 = scmp.lt.s32.totalorder %s4481_s27, %s4481_s27 }
  0x80   : > { %p4484_p11 = pnand %p4482_p10, %p4822_p8  ;;  %p4491_p2 = por %p4490_p0, %p4489_p13 }
  0x82   : > { %p4485_p12 = pneg %p4484_p11 }
  0x84   : > { %p4492_p5 = pnand %p4491_p2, %p4485_p12 }
  0x86   : > { %4495 = shalt.err (!%p4492_p5)
}
  0x87   : > { %4247 = dma.hbm_to_vmem [thread:$0]  (!%p4806_p6), %s5634_s6, 512, %s337_s23, [#allocation13], %s5614_s24, %s5614_s24, %s5615_s16  }
  0x88   : > { %s5635_s8 = sld [smem:[#allocation32_spill]] }
  0x8e   : > { %s4496_s11 = scalar_lea.hbm %s5635_s8, 512 }
  0x8f   : > { %p4497_p7 = scmp.ne.s32.totalorder %s5635_s8, %s4496_s11  ;;  %p4503_p1 = scmp.lt.u32.totalorder %s4496_s11, %s5635_s8 }
  0x91   : > { %p4499_p9 = pnand %p4497_p7, %p4822_p8 }
  0x93   : > { %p4500_p4 = pneg %p4499_p9 }
  0x95   : > { %p4505_p3 = pnand %p4503_p1, %p4500_p4 }
  0x97   : > { %4508 = shalt.err (!%p4505_p3)
}
  0x98   : > { %s4509_s22 = scalar_lea.vmem %s363_s28, 512  ;;  %p4517_p13 = scmp.lt.s32.totalorder %s363_s28, %s363_s28 }
  0x99   : > { %p4510_p10 = scmp.ne.s32.totalorder %s363_s28, %s4509_s22  ;;  %p4518_p0 = scmp.lt.s32.totalorder %s4509_s22, %s4509_s22 }
  0x9b   : > { %p4512_p11 = pnand %p4510_p10, %p4822_p8  ;;  %p4519_p2 = por %p4518_p0, %p4517_p13 }
  0x9d   : > { %p4513_p12 = pneg %p4512_p11 }
  0x9f   : > { %p4520_p5 = pnand %p4519_p2, %p4513_p12 }
  0xa1   : > { %4523 = shalt.err (!%p4520_p5)
}
  0xa2   : > { %4253 = dma.hbm_to_vmem [thread:$0]  (!%p4806_p6), %s5635_s8, 512, %s363_s28, [#allocation16], %s5614_s24, %s5614_s24, %s5615_s16  }
  0xa3   : > { %s3827_s25 = sadd.s32 4294967294, %s4682_s18   ;;  %s43_s21 = sadd.s32 1, %s4678_s17 }
  0xa4   : > { %s52_s27 = sadd.s32 1, %s4670_s15  ;;  %p45_p8 = scmp.ge.s32.totalorder %s43_s21, 2 }
  0xa5   : > { %p59_p7 = scmp.ne.s32.totalorder %s4670_s15, %s4666_s14  ;;  %p60_p9 = scmp.eq.s32.totalorder %s4682_s18, 0 }
  0xa6   : > { %p65_p4 = scmp.ne.s32.totalorder %s4666_s14, %s4662_s13  ;;  %s5667_s21 = smov (%p45_p8, %s43_s21), 0 }
  0xa7   : > { %p4936_p1 = por %p60_p9, %p59_p7  ;;  %p5637_p3 = scmp.eq.s32.totalorder %s4792_s19, 0 }
  0xa8   : > { %s47_s4 = ssub.s32 %s4678_s17, %s5667_s21  ;;  %p283_p10 = scmp.eq.s32.totalorder %s4792_s19, 1 }
  0xa9   : > { %p4942_p6 = por %p5637_p3, %p65_p4  ;;  %p50_p11 = scmp.eq.s32.totalorder %s47_s4, 0 }
  0xaa   : > { %p289_p12 = scmp.eq.s32.totalorder %s3827_s25, 1  ;;  %p4949_p13 = por %p283_p10, %p59_p7 }
  0xab   : > { %s5638_s28 = scalar_select %p4942_p6, 1, 0 }
  0xac   : > { %s5639_s5 = scalar_select %p4949_p13, 1, 0 }
  0xad   : > { %p4270_p0 = scmp.lt.s32.totalorder %s4682_s18, 2  ;;  %p4957_p2 = por %p289_p12, %p65_p4 }
  0xae   : > { %s4955_s9 = scalar_select %p50_p11, %s4670_s15, %s52_s27  }
  0xaf   : > { %s5640_s11 = scalar_select %p4957_p2, 1, 0 }
  0xb0   : > { %s4962_s12 = sand.u32 1, %s4670_s15   ;;  %s3909_s26 = sshll.u32 %s4678_s17, 8 }
  0xb1   : > { %s3835_s30 = sshll.u32 %s4962_s12, 4  ;;  %s5641_s0 = sld [smem:[#allocation26_spill]] }
  0xb2   : > { %s383_s10 = scalar_lea.vmem [#allocation6], %s3835_s30  ;;  %p4975_p5 = pnand %p4270_p0, %p4936_p1 }
  0xb3   : > { %s392_s25 = sshll.u32 %s383_s10, 4  ;;  %s3838_s24 = sshll.u32 %s4962_s12, 3  ;;  %s4971_s25 = int_to_ptr.vmem [resolvable:$true] %s392_s25 }
  0xb4   : > { %s380_s29 = scalar_lea.sflag [#allocation7], %s4962_s12  ;;  %p4526_p7 = pneg %p4975_p5 }
  0xb7   : > { %s4969_s23 = scalar_lea.hbm %s5641_s0, %s3909_s26  ;;  %s4529_s3 = scalar_lea.hbm %s5641_s0, 512 }
  0xb8   : > { %s4524_s26 = scalar_lea.hbm %s4969_s23, 256  ;;  %p4530_p1 = scmp.lt.u32.totalorder %s4969_s23, %s5641_s0 }
  0xb9   : > { %p4525_p8 = scmp.ne.s32.totalorder %s4969_s23, %s4524_s26  ;;  %p4531_p3 = scmp.lt.u32.totalorder %s4529_s3, %s4524_s26 }
  0xba   : > { %p4533_p11 = scmp.lt.u32.totalorder %s4524_s26, %s4969_s23 }
  0xbb   : > { %p4527_p9 = pnand %p4526_p7, %p4525_p8  ;;  %p4532_p10 = por %p4531_p3, %p4530_p1 }
  0xbd   : > { %p4528_p4 = pneg %p4527_p9  ;;  %p4534_p12 = por %p4533_p11, %p4532_p10 }
  0xbf   : > { %p4535_p0 = pnand %p4534_p12, %p4528_p4 }
  0xc1   : > { %4538 = shalt.err (!%p4535_p0)
}
  0xc2   : > { %s4539_s4 = scalar_lea.vmem %s4971_s25, 256  ;;  %s4691_s30 = smov [#allocation6]  }
  0xc3   : > { %p4540_p8 = scmp.ne.s32.totalorder %s4971_s25, %s4539_s4  ;;  %s4544_s22 = sshll.u32 %s4691_s30, 4  ;;  %s4545_s22 = int_to_ptr.vmem [resolvable:$false] %s4544_s22 }
  0xc4   : > { %s4546_s16 = scalar_lea.vmem %s4545_s22, 512  ;;  %p4547_p13 = scmp.lt.s32.totalorder %s4971_s25, %s4545_s22 }
  0xc5   : > { %p4542_p9 = pnand %p4540_p8, %p4526_p7  ;;  %p4548_p1 = scmp.lt.s32.totalorder %s4546_s16, %s4539_s4 }
  0xc7   : > { %p4543_p2 = pneg %p4542_p9  ;;  %p4549_p3 = por %p4548_p1, %p4547_p13 }
  0xc9   : > { %p4550_p10 = pnand %p4549_p3, %p4543_p2 }
  0xcb   : > { %4553 = shalt.err (!%p4550_p10)
}
  0xcc   : > { %s5643_s26 = smov 8   ;;  %s5644_s3 = smov 128  }
  0xcd   : > { %4257 = dma.hbm_to_vmem [thread:$0]  (!%p4975_p5), %s4969_s23, 256, %s4971_s25, %s380_s29, %s5644_s3, %s5644_s3, %s5643_s26  }
  0xce   : > { %s3839_s10 = sshll.u32 %s4678_s17, 7  ;;  %s406_s16 = scalar_lea.vmem [#allocation9], %s3838_s24 }
  0xcf   : > { %s5016_s22 = scalar_lea.hbm %s5600_s1, %s3839_s10  ;;  %s413_s0 = sshll.u32 %s406_s16, 4  ;;  %s414_s0 = int_to_ptr.vmem [resolvable:$true] %s413_s0 }
  0xd0   : > { %s5645_s6 = sand.u32 1, %s4682_s18   ;;  %s4554_s8 = scalar_lea.hbm %s5016_s22, 128 }
  0xd1   : > { %s403_s7 = scalar_lea.sflag [#allocation10], %s5645_s6  ;;  %p4555_p13 = scmp.ne.s32.totalorder %s5016_s22, %s4554_s8 }
  0xd2   : > { %s4559_s29 = scalar_lea.hbm %s5600_s1, 256  ;;  %p4560_p11 = scmp.lt.u32.totalorder %s5016_s22, %s5600_s1 }
  0xd3   : > { %p4557_p2 = pnand %p4555_p13, %p4526_p7  ;;  %p4561_p12 = scmp.lt.u32.totalorder %s4559_s29, %s4554_s8 }
  0xd4   : > { %p4563_p8 = scmp.lt.u32.totalorder %s4554_s8, %s5016_s22 }
  0xd5   : > { %p4558_p4 = pneg %p4557_p2  ;;  %p4562_p0 = por %p4561_p12, %p4560_p11 }
  0xd7   : > { %p4564_p9 = por %p4563_p8, %p4562_p0 }
  0xd9   : > { %p4565_p1 = pnand %p4564_p9, %p4558_p4 }
  0xdb   : > { %4568 = shalt.err (!%p4565_p1)
}
  0xdc   : > { %s4569_s6 = scalar_lea.vmem %s414_s0, 128  ;;  %s4692_s24 = smov [#allocation9]  }
  0xdd   : > { %p4570_p3 = scmp.ne.s32.totalorder %s414_s0, %s4569_s6  ;;  %s4574_s3 = sshll.u32 %s4692_s24, 4  ;;  %s4575_s3 = int_to_ptr.vmem [resolvable:$false] %s4574_s3 }
  0xde   : > { %s4576_s10 = scalar_lea.vmem %s4575_s3, 256  ;;  %p4577_p2 = scmp.lt.s32.totalorder %s414_s0, %s4575_s3 }
  0xdf   : > { %p4572_p10 = pnand %p4570_p3, %p4526_p7  ;;  %p4578_p6 = scmp.lt.s32.totalorder %s4576_s10, %s4569_s6 }
  0xe1   : > { %p4573_p13 = pneg %p4572_p10  ;;  %p4579_p11 = por %p4578_p6, %p4577_p2 }
  0xe3   : > { %p4580_p12 = pnand %p4579_p11, %p4573_p13 }
  0xe5   : > { %4583 = shalt.err (!%p4580_p12)
}
  0xe6   : > { %4260 = dma.hbm_to_vmem [thread:$0]  (!%p4975_p5), %s5016_s22, 128, %s414_s0, %s403_s7  }
  0xe7   : > { %p5646_p4 = scmp.ne.s32.totalorder %s5628_s20, 0 }
  0xe8   : > { %s5044_s8 = sand.u32 (!%p5646_p4), 1, %s4666_s14   ;;  %p5647_p6 = scmp.ne.s32.totalorder (!%p5646_p4), %s5638_s28, 0 }
  0xe9   : > { %422 = sbr.rel (%p5646_p4) target bundleno = 2860 (0xb2c), region = 60  ;;  %s3841_s30 = sshll.u32 (!%p5646_p4), %s5044_s8, 4 }
  0xea   : > { %s425_s4 = scalar_lea.sflag (!%p5646_p4), [#allocation7], %s5044_s8  ;;  %s5048_s16 = scalar_lea.vmem (!%p5646_p4), [#allocation6], %s3841_s30 }
  0xf0   : > { %4637 = dma.done.wait (%p5647_p6), %s425_s4, 256  }
  0xf1   : > { %4639 = vsyncadd (%p5647_p6), %s425_s4, 4294967040  ;;  %s433_s0 = sand.u32 1, %s4792_s19   ;;  %s3842_s7 = sshll.u32 %s5044_s8, 3 }
  0xf2   : > { %s434_s20 = scalar_lea.sflag [#allocation10], %s433_s0  ;;  %s437_s27 = scalar_lea.vmem [#allocation9], %s3842_s7 }
  0xf3   : > { %4641 = dma.done.wait (%p5647_p6), %s434_s20, 128  }
  0xf4   : > { %4643 = vsyncadd (%p5647_p6), %s434_s20, 4294967168  ;;  %p5648_p5 = scmp.eq.s32.totalorder %s4792_s19, 0 }
  0xf6   : > { %4645 = dma.done.wait (%p5648_p5), [#allocation10], 16   ;;  %p5649_p7 = pmov %p5648_p5 }
  0xf7   : > { %p5650_p0 = pmov %p5648_p5 }
  0xf8   : > { %4647 = vsyncadd (%p5649_p7), [#allocation10], 4294967280 }
  0xf9   : > { %4649 = dma.done.wait (%p5650_p0), [#allocation13], 528   ;;  %p5651_p8 = pmov %p5650_p0 }
  0xfa   : > { %p5652_p9 = pmov %p5650_p0 }
  0xfb   : > { %4651 = vsyncadd (%p5651_p8), [#allocation13], 4294966768 }
  0xfc   : > { %4653 = dma.done.wait (%p5652_p9), [#allocation16], 1024   ;;  %p5653_p1 = pmov %p5650_p0 }
  0xfd   : > { %vm507_vm0 = vcmask 261120   ;;  %v504_v0 = vld [vmem:[%s437_s27] sm:$0xff]  ;;  %v536_v7 = vld [vmem:[#allocation14] sm:$0xff]  ;;  %v4693_v10 = vmov 0.0|0.0   ;;  %vm4694_vm1 = vmmov 0   ;;  %v4695_v18 = vmov 0.0  }
  0xfe   : > { %4655 = vsyncadd (%p5653_p1), [#allocation16], 4294966272  ;;  %v508_v1 = vsel %vm507_vm0, %v504_v0, 0.0  ;;  %v537_v8 = vld [vmem:[#allocation14 + $0x8] sm:$0xff]  ;;  %v613_v9 = vld [vmem:[#allocation15] sm:$0xff]  ;;  %4144 = vmatprep.subr.bf16.mxu0 %v4693_v10  ;;  %4150 = vmatprep.subr.bf16.mxu1 %v4693_v10  ;;  %s4696_s19 = smov 104   ;;  %v776_v48 = vlaneseq }
  0xff   : > { %509 = vadd.xlane.f32.xlu0 %v508_v1  ;;  %v4145_v11 = vpack.c.bf16 %v537_v8, %v536_v7  ;;  %v614_v12 = vld [vmem:[#allocation15 + $0x8] sm:$0xff]  ;;  %v538_v13 = vld [vmem:[#allocation14 + $0x10] sm:$0xff]  ;;  %v539_v14 = vld [vmem:[#allocation14 + $0x18] sm:$0xff]  ;;  %3990 = vmatprep.mubr.msk.f32.mxu0 %vm4694_vm1, %v4695_v18  ;;  %s4697_s28 = smov 120   ;;  %s4698_s22 = smov 112   ;;  %vm907_vm2 = vcmask 64512  }
 0x100   : > { %v5078_v15 = vpack.c.bf16 %v614_v12, %v613_v9  ;;  %v615_v16 = vld [vmem:[#allocation15 + $0x10] sm:$0xff]  ;;  %v616_v17 = vld [vmem:[#allocation15 + $0x18] sm:$0xff]  ;;  %4001 = vmatprep.mubr.msk.f32.mxu1 %vm4694_vm1, %v4695_v18  ;;  %v4148_v19 = vpack.c.bf16 %v539_v14, %v538_v13  ;;  %v687_v27 = vld [vmem:[#allocation17] sm:$0xff]  ;;  %v4699_v46 = vmov 1983009808   ;;  %v777_v52 = vshrl.u32 %v776_v48, 7 }
 0x101   : > { %4146 = vmatpush3.bf16.msra.mxu0 %v4145_v11  ;;  %v5086_v20 = vpack.c.bf16 %v616_v17, %v615_v16  ;;  %v3849_v25 = vld [vmem:[#allocation11] ss:$0 sm:$0xff]  ;;  %v688_v28 = vld [vmem:[#allocation17 + $0x8] sm:$0xff]  ;;  %v3850_v29 = vld [vmem:[#allocation12] ss:$0 sm:$0xff]  ;;  %v774_v47 = vunpack.c.l.s4 %v4699_v46  ;;  %vm1386_vm3 = vcmask 7168  }
 0x102   : > { %4152 = vmatpush3.bf16.msra.mxu1 %v5078_v15  ;;  %4147 = vmatprep.subr.bf16.mxu0 %v4693_v10  ;;  %v5092_v31 = vpack.c.bf16 %v688_v28, %v687_v27  ;;  %v689_v33 = vld [vmem:[#allocation17 + $0x10] sm:$0xff]  ;;  %v690_v34 = vld [vmem:[#allocation17 + $0x18] sm:$0xff]  ;;  %v4700_v49 = vmov 1934713408   ;;  %s5654_s26 = sld [smem:[#allocation27_spill]]  ;;  %vm4180_vm4 = vmpackc.low %vm907_vm2, %vm907_vm2  ;;  %vm2678_vm5 = vcmask 130048  }
 0x103   : > { %4153 = vmatprep.subr.bf16.mxu1 %v4693_v10  ;;  %v5097_v35 = vpack.c.bf16 %v690_v34, %v689_v33  ;;  %v5123_v42 = vld [vmem:[%s5048_s16 + $0x8] sm:$0xff]  ;;  %v5128_v44 = vld [vmem:[%s5048_s16] sm:$0xff]  ;;  %v806_v50 = vunpack.c.l.s4 %v4700_v49  ;;  %v775_v51 = vunpack.c.0.s8 %v774_v47  ;;  %s5655_s3 = sld [smem:[#allocation33_spill]]  ;;  %s5656_s27 = sld [smem:[#allocation25_spill]]  ;;  %vm3581_vm6 = vcmask 195584  }
 0x104   : > { %v1857_v43 = vsel %vm507_vm0, %v5123_v42, 0.0  ;;  %v1854_v45 = vsel %vm507_vm0, %v5128_v44, 0.0  ;;  %s498_s25 = scalar_lea.vmem [#allocation18], %s3842_s7  ;;  %s5657_s6 = sld [smem:[#allocation34_spill]] }
 0x105   : > { %4149 = vmatpush3.bf16.msra.mxu0 %v4148_v19  ;;  %v807_v55 = vunpack.c.0.s8 %v806_v50  ;;  %v5132_v56 = vsub.s32 %v775_v51, %v777_v52  ;;  %s3675_s29 = sshll.u32 %s498_s25, 4  ;;  %s3662_s10 = scalar_lea.sflag [#allocation8], %s5044_s8  ;;  %s5551_s29 = int_to_ptr.vmem [resolvable:$true] %s3675_s29 }
 0x106   : > { %4155 = vmatpush3.bf16.msra.mxu1 %v5086_v20  ;;  %4156 = vmatprep.subr.bf16.mxu0 %v4693_v10  ;;  %s4584_s30 = scalar_lea.vmem %s5551_s29, 128  ;;  %p5658_p10 = scmp.ne.s32.totalorder %s5639_s5, 0 }
 0x107   : > { %4015 = vmatprep.subr.mxu1 %v4695_v18  ;;  %v5134_v62 = vsub.s32 %v807_v55, %v777_v52  ;;  %p4585_p3 = scmp.ne.s32.totalorder %s5551_s29, %s4584_s30  ;;  %s4705_s7 = smov [#allocation18]  }
 0x108   : > { %s4588_s4 = sshll.u32 %s4705_s7, 4  ;;  %s4589_s4 = int_to_ptr.vmem [resolvable:$false] %s4588_s4 }
 0x109   : > { %s3906_s23 = sshll.u32 %s5656_s27, 7  ;;  %p4586_p13 = pnand %p4585_p3, %p5658_p10 }
 0x10a   : > { %s5549_s24 = scalar_lea.hbm %s5657_s6, %s3906_s23  ;;  %s4590_s16 = scalar_lea.vmem %s4589_s4, 256 }
 0x10b   : > { %p4587_p2 = pneg %p4586_p13  ;;  %p4591_p11 = scmp.lt.s32.totalorder %s5551_s29, %s4589_s4 }
 0x10c   : > { %p4592_p12 = scmp.lt.s32.totalorder %s4590_s16, %s4584_s30 }
 0x10e   : > { %p4593_p4 = por %p4592_p12, %p4591_p11 }
 0x110   : > { %p4594_p6 = pnand %p4593_p4, %p4587_p2 }
 0x18c   : > { %v510_v2 = vpop.xlane.xlu0 %509 }
 0x18d   : > { %v512_v3 = vmul.f32 0.03125, %v510_v2 }
 0x18f   : > { %v513_v4 = vsub.f32 %v504_v0, %v512_v3 }
 0x191   : > { %v514_v5 = vmul.f32 %v513_v4, %v513_v4 }
 0x193   : > { %v515_v6 = vsel %vm507_vm0, %v514_v5, 0.0 }
 0x194   : > { %516 = vadd.xlane.f32.xlu0 %v515_v6 }
 0x221   : > { %v517_v21 = vpop.xlane.xlu0 %516 }
 0x222   : > { %v518_v22 = vmul.f32 0.03125, %v517_v21 }
 0x224   : > { %v519_v23 = vadd.f32 1e-05, %v518_v22 }
 0x226   : > { %4346 = vrsqrt.f32 %v519_v23 }
 0x230   : > { %v4347_v24 = vpop.eup %4346 }
 0x231   : > { %v521_v26 = vmul.f32 %v4347_v24, %v513_v4 }
 0x233   : > { %v528_v30 = vmul.f32 %v3849_v25, %v521_v26 }
 0x235   : > { %v535_v32 = vadd.f32 %v3850_v29, %v528_v30 }
 0x237   : > { %3991 = vmatmul.mubr.msk.f32.vlgmr.msra.gmra.mrb[0].mxu0 %vm507_vm0, %v535_v32  ;;  %4002 = vmatmul.mubr.msk.f32.vlgmr.msra.gmra.mrb[0].mxu1 %vm507_vm0, %v535_v32 }
 0x238   : > { %4158 = vmatpush3.bf16.msra.mxu0 %v5092_v31  ;;  %4012 = vmatprep.mubr.msk.f32.mxu0 %vm4694_vm1, %v4695_v18 }
 0x239   : > { %4159 = vmatprep.subr.bf16.mxu0 %v4693_v10  ;;  %4017 = vmatprep.mubr.msk.f32.mxu1 %vm4694_vm1, %v4695_v18 }
 0x23c   : > { %4161 = vmatpush3.bf16.msra.mxu0 %v5097_v35 }
 0x23d   : > { %4035 = vmatprep.subr.mxu0 %v4695_v18 }
 0x23f   : > { %4013 = vmatmul.mubr.msk.f32.vlgmr.msra.gmra.mrb[2].mxu0 %vm507_vm0, %v535_v32 }
 0x240   : > { %4037 = vmatprep.mubr.msk.f32.mxu0 %vm4694_vm1, %v4695_v18 }
 0x30a   : > { %v5109_v36 = vpop.f32.mrb[0].mxu0  ;;  %v683_v37 = vpop.f32.mrb[0].mxu1 }
 0x30b   : > { %919 = vrot.lane.b32.xlu0 %v683_v37, %s4696_s19  ;;  %913 = vrot.lane.b32.xlu1 %v683_v37, %s4697_s28  ;;  %v3992_v38 = vpop.f32.mrb[1].mxu0  ;;  %v4003_v39 = vpop.f32.mrb[1].mxu1 }
 0x30f   : > { %916 = vrot.lane.b32.xlu1 %v683_v37, %s4698_s22 }
 0x312   : > { %v5114_v40 = vpop.f32.mrb[2].mxu0 }
 0x313   : > { %v4014_v41 = vpop.f32.mrb[3].mxu0  ;;  %762 = vrot.lane.b32.xlu1 %v5109_v36, %s4697_s28 }
 0x317   : > { %765 = vrot.lane.b32.xlu1 %v5109_v36, %s4698_s22 }
 0x31b   : > { %768 = vrot.lane.b32.xlu1 %v5109_v36, %s4696_s19 }
 0x32a   : > { %1858 = vadd.xlane.f32.xlu0 %v1857_v43 }
 0x33f   : > { %1855 = vadd.xlane.f32.xlu1 %v1854_v45 }
 0x37d   : > { %v920_v53 = vpop.permute.xlu0 %919  ;;  %v914_v54 = vpop.permute.xlu1 %913 }
 0x37e   : > { %v938_v57 = vcombine.low %v914_v54, %v920_v53  ;;  %v939_v58 = vcombine.high %v914_v54, %v920_v53 }
 0x380   : > { %v946_v63 = vrot.slane %v938_v57, %v5132_v56  ;;  %v953_v0 = vrot.slane %v939_v58, %v5132_v56 }
 0x381   : > { %v917_v59 = vpop.permute.xlu1 %916 }
 0x382   : > { %v922_v60 = vcombine.low %v683_v37, %v917_v59  ;;  %v923_v61 = vcombine.high %v683_v37, %v917_v59 }
 0x384   : > { %v930_v1 = vrot.slane %v922_v60, %v5132_v56  ;;  %v937_v2 = vrot.slane %v923_v61, %v5132_v56 }
 0x385   : > { %v763_v3 = vpop.permute.xlu1 %762 }
 0x386   : > { %v954_v4 = vcombine.low %v930_v1, %v946_v63  ;;  %v955_v5 = vcombine.high %v930_v1, %v946_v63  ;;  %v970_v6 = vcombine.low %v937_v2, %v953_v0  ;;  %v971_v7 = vcombine.high %v937_v2, %v953_v0 }
 0x388   : > { %v962_v8 = vrot.slane %v954_v4, %v5134_v62  ;;  %v969_v9 = vrot.slane %v955_v5, %v5134_v62  ;;  %v978_v11 = vrot.slane %v970_v6, %v5134_v62  ;;  %v985_v12 = vrot.slane %v971_v7, %v5134_v62 }
 0x389   : > { %v766_v13 = vpop.permute.xlu1 %765 }
 0x38a   : > { %v990_v14 = vcombine.low %v962_v8, %v969_v9  ;;  %v3856_v16 = vcombine.high %v962_v8, %v969_v9  ;;  %v1006_v17 = vcombine.low %v978_v11, %v985_v12  ;;  %v3857_v19 = vcombine.high %v978_v11, %v985_v12 }
 0x38b   : > { %v771_v25 = vcombine.low %v5109_v36, %v766_v13  ;;  %v772_v26 = vcombine.high %v5109_v36, %v766_v13 }
 0x38c   : > { %v997_v21 = vrot.slane %v990_v14, %v5132_v56  ;;  %v1005_v22 = vrot.slane %v3856_v16, %v5132_v56  ;;  %v1013_v23 = vrot.slane %v1006_v17, %v5132_v56  ;;  %v1021_v24 = vrot.slane %v3857_v19, %v5132_v56 }
 0x38d   : > { %v769_v27 = vpop.permute.xlu1 %768  ;;  %v779_v37 = vrot.slane %v771_v25, %v5132_v56  ;;  %v786_v38 = vrot.slane %v772_v26, %v5132_v56 }
 0x38e   : > { %v1022_v28 = vcombine.low %v997_v21, %v1005_v22  ;;  %v1038_v29 = vcombine.low %v1013_v23, %v1021_v24  ;;  %v787_v30 = vcombine.low %v763_v3, %v769_v27  ;;  %v788_v32 = vcombine.high %v763_v3, %v769_v27 }
 0x38f   : > { %v1023_v2 = vcombine.high %v997_v21, %v1005_v22  ;;  %v1039_v3 = vcombine.high %v1013_v23, %v1021_v24 }
 0x390   : > { %v1030_v33 = vrot.slane %v1022_v28, %v5134_v62  ;;  %v1046_v34 = vrot.slane %v1038_v29, %v5134_v62  ;;  %v795_v39 = vrot.slane %v787_v30, %v5132_v56  ;;  %v802_v41 = vrot.slane %v788_v32, %v5132_v56 }
 0x391   : > { %v1037_v14 = vrot.slane %v1023_v2, %v5134_v62  ;;  %v1053_v16 = vrot.slane %v1039_v3, %v5134_v62 }
 0x392   : > { %v1054_v43 = vcombine.low %v1030_v33, %v1046_v34  ;;  %v803_v36 = vcombine.low %v779_v37, %v795_v39  ;;  %v804_v45 = vcombine.high %v779_v37, %v795_v39  ;;  %v819_v46 = vcombine.low %v786_v38, %v802_v41 }
 0x393   : > { %v820_v47 = vcombine.high %v786_v38, %v802_v41  ;;  %v1055_v13 = vcombine.high %v1030_v33, %v1046_v34  ;;  %v1056_v17 = vcombine.low %v1037_v14, %v1053_v16  ;;  %v1057_v19 = vcombine.high %v1037_v14, %v1053_v16 }
 0x394   : > { %4016 = vmatpush3.xpose.msk.msra.mxu1 %vm907_vm2, %v1054_v43  ;;  %v811_v48 = vrot.slane %v803_v36, %v5134_v62  ;;  %v818_v49 = vrot.slane %v804_v45, %v5134_v62  ;;  %v827_v50 = vrot.slane %v819_v46, %v5134_v62 }
 0x395   : > { %v834_v51 = vrot.slane %v820_v47, %v5134_v62  ;;  %4020 = vmatprep.subr.mxu1 %v4695_v18 }
 0x396   : > { %v839_v52 = vcombine.low %v811_v48, %v818_v49  ;;  %v3854_v53 = vcombine.high %v811_v48, %v818_v49 }
 0x397   : > { %v855_v54 = vcombine.low %v827_v50, %v834_v51  ;;  %v3855_v55 = vcombine.high %v827_v50, %v834_v51 }
 0x398   : > { %v846_v57 = vrot.slane %v839_v52, %v5132_v56  ;;  %v854_v58 = vrot.slane %v3854_v53, %v5132_v56 }
 0x399   : > { %v862_v59 = vrot.slane %v855_v54, %v5132_v56  ;;  %v870_v60 = vrot.slane %v3855_v55, %v5132_v56 }
 0x39a   : > { %v871_v61 = vcombine.low %v846_v57, %v854_v58  ;;  %v872_v63 = vcombine.high %v846_v57, %v854_v58 }
 0x39b   : > { %v887_v0 = vcombine.low %v862_v59, %v870_v60  ;;  %v888_v1 = vcombine.high %v862_v59, %v870_v60 }
 0x39c   : > { %v879_v4 = vrot.slane %v871_v61, %v5134_v62  ;;  %v886_v6 = vrot.slane %v872_v63, %v5134_v62 }
 0x39d   : > { %v895_v5 = vrot.slane %v887_v0, %v5134_v62  ;;  %v902_v7 = vrot.slane %v888_v1, %v5134_v62 }
 0x39f   : > { %v903_v8 = vcombine.low %v879_v4, %v895_v5  ;;  %v904_v9 = vcombine.high %v879_v4, %v895_v5  ;;  %v905_v11 = vcombine.low %v886_v6, %v902_v7  ;;  %v906_v12 = vcombine.high %v886_v6, %v902_v7 }
 0x3a1   : > { %908 = vst.msk [vmem:[#allocation2] sm:$0xff] %vm907_vm2, %v903_v8  ;;  %4018 = vmatmul.mubr.msk.f32.vlgmr.msra.gmra.mrb[2].mxu1 %vm907_vm2, %v903_v8  ;;  %909 = vst.msk [vmem:[#allocation2 + $0x8] sm:$0xff] %vm907_vm2, %v904_v9 }
 0x3a2   : > { %910 = vst.msk [vmem:[#allocation2 + $0x10] sm:$0xff] %vm907_vm2, %v905_v11  ;;  %911 = vst.msk [vmem:[#allocation2 + $0x18] sm:$0xff] %vm907_vm2, %v906_v12  ;;  %4021 = vmatpush3.xpose.msk.msra.mxu1 %vm907_vm2, %v1055_v13  ;;  %4022 = vmatprep.mubr.msk.f32.mxu1 %vm4694_vm1, %v4695_v18 }
 0x3a3   : > { %4025 = vmatprep.subr.mxu1 %v4695_v18 }
 0x3a5   : > { %4023 = vmatmul.mubr.msk.f32.vlgmr.msra.gmra.mrb[4].mxu1 %vm907_vm2, %v904_v9 }
 0x3a6   : > { %4026 = vmatpush3.xpose.msk.msra.mxu1 %vm907_vm2, %v1056_v17  ;;  %4027 = vmatprep.mubr.msk.f32.mxu1 %vm4694_vm1, %v4695_v18 }
 0x3a7   : > { %4030 = vmatprep.subr.mxu1 %v4695_v18 }
 0x3a9   : > { %4028 = vmatmul.mubr.msk.f32.vlgmr.msra.gmra.mrb[6].mxu1 %vm907_vm2, %v905_v11 }
 0x3aa   : > { %4031 = vmatpush3.xpose.msk.msra.mxu1 %vm907_vm2, %v1057_v19  ;;  %4032 = vmatprep.mubr.msk.f32.mxu1 %vm4694_vm1, %v4695_v18 }
 0x3ab   : > { %4040 = vmatprep.subr.mxu1 %v4695_v18 }
 0x3ad   : > { %4033 = vmatmul.mubr.msk.f32.vlgmr.msra.gmra.mrb[8].mxu1 %vm907_vm2, %v906_v12 }
 0x3ae   : > { %4042 = vmatprep.mubr.msk.f32.mxu1 %vm4694_vm1, %v4695_v18 }
 0x3b7   : > { %v1859_v21 = vpop.xlane.xlu0 %1858 }
 0x3b8   : > { %v1862_v22 = vmul.f32 0.03125, %v1859_v21 }
 0x3ba   : > { %v5195_v23 = vsub.f32 %v5123_v42, %v1862_v22 }
 0x3bc   : > { %v1866_v24 = vmul.f32 %v5195_v23, %v5195_v23 }
 0x3be   : > { %v1870_v25 = vsel %vm507_vm0, %v1866_v24, 0.0 }
 0x3bf   : > { %1871 = vadd.xlane.f32.xlu1 %v1870_v25 }
 0x3cc   : > { %v1856_v26 = vpop.xlane.xlu1 %1855 }
 0x3cd   : > { %v1861_v27 = vmul.f32 0.03125, %v1856_v26 }
 0x3cf   : > { %v5201_v28 = vsub.f32 %v5128_v44, %v1861_v27 }
 0x3d0   : > { %1411 = vrot.lane.b32.xlu1 %v5114_v40, %s4698_s22 }
 0x3d1   : > { %v1865_v29 = vmul.f32 %v5201_v28, %v5201_v28 }
 0x3d3   : > { %v1867_v42 = vsel %vm507_vm0, %v1865_v29, 0.0 }
 0x3d4   : > { %1868 = vadd.xlane.f32.xlu0 %v1867_v42 }
 0x3ea   : > { %1408 = vrot.lane.b32.xlu0 %v5114_v40, %s4697_s28 }
 0x44c   : > { %v1872_v46 = vpop.xlane.xlu1 %1871 }
 0x44d   : > { %v1874_v53 = vmul.f32 0.03125, %v1872_v46 }
 0x44f   : > { %v1876_v60 = vadd.f32 1e-05, %v1874_v53 }
 0x450   : > { %v1412_v48 = vpop.permute.xlu1 %1411 }
 0x451   : > { %v1417_v58 = vcombine.low %v5114_v40, %v1412_v48  ;;  %v1418_v59 = vcombine.high %v5114_v40, %v1412_v48 }
 0x453   : > { %v1425_v3 = vrot.slane %v1417_v58, %v5132_v56  ;;  %v1432_v4 = vrot.slane %v1418_v59, %v5132_v56 }
 0x461   : > { %v1869_v47 = vpop.xlane.xlu0 %1868 }
 0x462   : > { %v1873_v52 = vmul.f32 0.03125, %v1869_v47 }
 0x464   : > { %v1875_v55 = vadd.f32 1e-05, %v1873_v52 }
 0x465   : > { %v1409_v49 = vpop.permute.xlu0 %1408 }
 0x466   : > { %4348 = vrsqrt.f32 %v1875_v55  ;;  %v3873_v55 = vld [vmem:[%s5654_s26] ss:$0 sm:$0xff] }
 0x467   : > { %4350 = vrsqrt.f32 %v1876_v60 }
 0x474   : > { %v1130_v30 = vpop.f32.mrb[2].mxu1 }
 0x475   : > { %v4019_v32 = vpop.f32.mrb[3].mxu1  ;;  %v1362_v33 = vsel %vm907_vm2, %v1130_v30, -inf }
 0x476   : > { %1363 = vmax.xlane.f32.xlu1 %v1362_v33 }
 0x478   : > { %v1206_v34 = vpop.f32.mrb[4].mxu1 }
 0x479   : > { %v4024_v44 = vpop.f32.mrb[5].mxu1  ;;  %v1365_v37 = vsel %vm907_vm2, %v1206_v34, -inf }
 0x47a   : > { %1366 = vmax.xlane.f32.xlu0 %v1365_v37 }
 0x47c   : > { %v1282_v38 = vpop.f32.mrb[6].mxu1 }
 0x47d   : > { %v4029_v39 = vpop.f32.mrb[7].mxu1  ;;  %v1368_v41 = vsel %vm907_vm2, %v1282_v38, -inf }
 0x47e   : > { %1369 = vmax.xlane.f32.xlu1 %v1368_v41 }
 0x480   : > { %v5213_v43 = vpop.f32.mrb[8].mxu1 }
 0x481   : > { %v4034_v36 = vpop.f32.mrb[9].mxu1  ;;  %v1371_v45 = vsel %vm907_vm2, %v5213_v43, -inf }
 0x48f   : > { %1414 = vrot.lane.b32.xlu1 %v5114_v40, %s4696_s19 }
 0x4b3   : > { %1372 = vmax.xlane.f32.xlu1 %v1371_v45 }
 0x503   : > { %v1364_v50 = vpop.xlane.xlu1 %1363 }
 0x504   : > { %1387 = vst.msk [vmem:[#allocation3] sm:$0xff] %vm1386_vm3, %v1364_v50  ;;  %v1374_v57 = vsub.f32 %v1130_v30, %v1364_v50  ;;  %v4349_v30 = vpop.eup %4348  ;;  %v3872_v50 = vld [vmem:[%s5601_s2] ss:$0 sm:$0xff] }
 0x505   : > { %v4351_v37 = vpop.eup %4350  ;;  %v1879_v41 = vmul.f32 %v4349_v30, %v5201_v28 }
 0x506   : > { %v1378_v2 = vmul.f32 1.442695, %v1374_v57 }
 0x507   : > { %v1367_v51 = vpop.xlane.xlu0 %1366 }
 0x508   : > { %1388 = vst.msk [vmem:[#allocation3 + $0x8] sm:$0xff] %vm1386_vm3, %v1367_v51  ;;  %v1375_v61 = vsub.f32 %v1206_v34, %v1367_v51  ;;  %4352 = vpow2.f32 %v1378_v2  ;;  %v1887_v51 = vmul.f32 %v3872_v50, %v1879_v41 }
 0x50a   : > { %v1380_v7 = vmul.f32 1.442695, %v1375_v61  ;;  %v1895_v57 = vadd.f32 %v3873_v55, %v1887_v51 }
 0x50b   : > { %v1370_v54 = vpop.xlane.xlu1 %1369 }
 0x50c   : > { %1389 = vst.msk [vmem:[#allocation3 + $0x10] sm:$0xff] %vm1386_vm3, %v1370_v54  ;;  %v1376_v8 = vsub.f32 %v1282_v38, %v1370_v54  ;;  %4354 = vpow2.f32 %v1380_v7  ;;  %v1880_v54 = vmul.f32 %v4351_v37, %v5195_v23 }
 0x50e   : > { %v1382_v19 = vmul.f32 1.442695, %v1376_v8  ;;  %v1888_v23 = vmul.f32 %v3872_v50, %v1880_v54 }
 0x50f   : > { %v1415_v63 = vpop.permute.xlu1 %1414 }
 0x510   : > { %v1433_v0 = vcombine.low %v1409_v49, %v1415_v63  ;;  %v1434_v1 = vcombine.high %v1409_v49, %v1415_v63  ;;  %4356 = vpow2.f32 %v1382_v19  ;;  %v1896_v58 = vadd.f32 %v3873_v55, %v1888_v23 }
 0x512   : > { %v1441_v5 = vrot.slane %v1433_v0, %v5132_v56  ;;  %v1448_v6 = vrot.slane %v1434_v1, %v5132_v56  ;;  %v5239_v36 = vpop.eup %4352 }
 0x514   : > { %v1449_v9 = vcombine.low %v1425_v3, %v1441_v5  ;;  %v1450_v40 = vcombine.high %v1425_v3, %v1441_v5  ;;  %v1465_v11 = vcombine.low %v1432_v4, %v1448_v6  ;;  %v1466_v12 = vcombine.high %v1432_v4, %v1448_v6 }
 0x516   : > { %v1457_v13 = vrot.slane %v1449_v9, %v5134_v62  ;;  %v1464_v14 = vrot.slane %v1450_v40, %v5134_v62  ;;  %v1473_v16 = vrot.slane %v1465_v11, %v5134_v62  ;;  %v1480_v17 = vrot.slane %v1466_v12, %v5134_v62  ;;  %v5243_v49 = vpop.eup %4354 }
 0x518   : > { %v1485_v21 = vcombine.low %v1457_v13, %v1464_v14  ;;  %v3866_v22 = vcombine.high %v1457_v13, %v1464_v14  ;;  %v1501_v24 = vcombine.low %v1473_v16, %v1480_v17  ;;  %v3867_v25 = vcombine.high %v1473_v16, %v1480_v17 }
 0x51a   : > { %v1492_v26 = vrot.slane %v1485_v21, %v5132_v56  ;;  %v1500_v27 = vrot.slane %v3866_v22, %v5132_v56  ;;  %v1508_v29 = vrot.slane %v1501_v24, %v5132_v56  ;;  %v1516_v42 = vrot.slane %v3867_v25, %v5132_v56  ;;  %v5254_v53 = vpop.eup %4356 }
 0x51c   : > { %v1517_v32 = vcombine.low %v1492_v26, %v1500_v27  ;;  %v1533_v33 = vcombine.low %v1508_v29, %v1516_v42  ;;  %v1518_v34 = vcombine.high %v1492_v26, %v1500_v27  ;;  %v1534_v44 = vcombine.high %v1508_v29, %v1516_v42 }
 0x51e   : > { %v1525_v38 = vrot.slane %v1517_v32, %v5134_v62  ;;  %v1541_v39 = vrot.slane %v1533_v33, %v5134_v62  ;;  %v1532_v45 = vrot.slane %v1518_v34, %v5134_v62  ;;  %v1548_v46 = vrot.slane %v1534_v44, %v5134_v62 }
 0x520   : > { %v1549_v47 = vcombine.low %v1525_v38, %v1541_v39  ;;  %v1550_v48 = vcombine.high %v1525_v38, %v1541_v39  ;;  %v1551_v28 = vcombine.low %v1532_v45, %v1548_v46  ;;  %v1552_v52 = vcombine.high %v1532_v45, %v1548_v46 }
 0x522   : > { %4036 = vmatpush3.msra.mxu0 %v1549_v47  ;;  %4041 = vmatpush3.msra.mxu1 %v1550_v48 }
 0x523   : > { %4038 = vmatmul.mubr.msk.f32.vlgmr.msra.gmra.mrb[4].mxu0 %vm907_vm2, %v5239_v36  ;;  %4043 = vmatmul.mubr.msk.f32.vlgmr.msra.gmra.mrb[10].mxu1 %vm907_vm2, %v5243_v49 }
 0x524   : > { %4045 = vmatprep.subr.mxu0 %v4695_v18  ;;  %4050 = vmatprep.subr.mxu1 %v4695_v18 }
 0x525   : > { %4046 = vmatpush3.msra.mxu0 %v1551_v28  ;;  %4051 = vmatpush3.msra.mxu1 %v1552_v52 }
 0x526   : > { %4047 = vmatprep.mubr.msk.f32.mxu0 %vm4694_vm1, %v4695_v18  ;;  %4163 = vmatprep.subr.bf16.mxu0 %v5078_v15 }
 0x527   : > { %4048 = vmatmul.mubr.msk.f32.vlgmr.msra.gmra.mrb[6].mxu0 %vm907_vm2, %v5254_v53  ;;  %4052 = vmatprep.mubr.msk.f32.mxu1 %vm4694_vm1, %v4695_v18 }
 0x528   : > { %4165 = vmatpush3.bf16.msra.mxu0 %v5078_v15  ;;  %4063 = vmatprep.mubr.msk.f32.mxu0 %vm507_vm0, %v1895_v57 }
 0x529   : > { %4167 = vmatprep.subr.bf16.mxu0 %v5086_v20  ;;  %4171 = vmatprep.subr.bf16.mxu1 %v5092_v31 }
 0x52c   : > { %4169 = vmatpush3.bf16.msra.mxu0 %v5086_v20 }
 0x52d   : > { %4178 = vmatprep.subr.bf16.mxu0 %v4693_v10 }
 0x52f   : > { %4064 = vmatmul.mubr.msk.f32.vlgmr.msra.gmra.mrb[8].mxu0 %vm507_vm0, %v1896_v58 }
 0x530   : > { %4081 = vmatprep.mubr.msk.f32.mxu0 %vm4694_vm1, %v4695_v18 }
 0x540   : > { %v1373_v59 = vpop.xlane.xlu1 %1372 }
 0x541   : > { %v1377_v15 = vsub.f32 %v5213_v43, %v1373_v59  ;;  %1390 = vst.msk [vmem:[#allocation3 + $0x18] sm:$0xff] %vm1386_vm3, %v1373_v59 }
 0x543   : > { %v1384_v60 = vmul.f32 1.442695, %v1377_v15 }
 0x545   : > { %4358 = vpow2.f32 %v1384_v60 }
 0x54f   : > { %v5278_v61 = vpop.eup %4358 }
 0x550   : > { %4053 = vmatmul.mubr.msk.f32.vlgmr.msra.gmra.mrb[12].mxu1 %vm907_vm2, %v5278_v61 }
 0x551   : > { %4173 = vmatpush3.bf16.msra.mxu1 %v5092_v31  ;;  %4074 = vmatprep.mubr.msk.f32.mxu1 %vm507_vm0, %v1895_v57 }
 0x552   : > { %4175 = vmatprep.subr.bf16.mxu1 %v5097_v35 }
 0x555   : > { %4177 = vmatpush3.bf16.msra.mxu1 %v5097_v35 }
 0x556   : > { %4182 = vmatprep.subr.bf16.mxu1 %v4693_v10 }
 0x558   : > { %4075 = vmatmul.mubr.msk.f32.vlgmr.msra.gmra.mrb[14].mxu1 %vm507_vm0, %v1896_v58 }
 0x559   : > { %4088 = vmatprep.mubr.msk.f32.mxu1 %vm4694_vm1, %v4695_v18 }
 0x5f6   : > { %v1622_v20 = vpop.f32.mrb[4].mxu0  ;;  %v1695_v43 = vpop.f32.mrb[10].mxu1 }
 0x5f7   : > { %1845 = vst.msk [vmem:[#allocation5] sm:$0xff] %vm907_vm2, %v1622_v20  ;;  %1846 = vst.msk [vmem:[#allocation5 + $0x8] sm:$0xff] %vm907_vm2, %v1695_v43  ;;  %v4039_v31 = vpop.f32.mrb[5].mxu0  ;;  %v4044_v63 = vpop.f32.mrb[11].mxu1 }
 0x5fa   : > { %v1768_v0 = vpop.f32.mrb[6].mxu0 }
 0x5fb   : > { %1847 = vst.msk [vmem:[#allocation5 + $0x10] sm:$0xff] %vm907_vm2, %v1768_v0  ;;  %v4049_v1 = vpop.f32.mrb[7].mxu0 }
 0x602   : > { %v4065_v35 = vpop.f32.mrb[8].mxu0 }
 0x603   : > { %2069 = vrot.lane.b32.xlu1 %v4065_v35, %s4697_s28  ;;  %v1973_v2 = vpop.f32.mrb[9].mxu0 }
 0x604   : > { %2067 = vrot.lane.b32.xlu0 %v1973_v2, %s4697_s28 }
 0x607   : > { %2075 = vrot.lane.b32.xlu1 %v4065_v35, %s4698_s22 }
 0x608   : > { %2073 = vrot.lane.b32.xlu0 %v1973_v2, %s4698_s22 }
 0x60b   : > { %2081 = vrot.lane.b32.xlu1 %v4065_v35, %s4696_s19 }
 0x60c   : > { %2079 = vrot.lane.b32.xlu0 %v1973_v2, %s4696_s19 }
 0x623   : > { %v1841_v3 = vpop.f32.mrb[12].mxu1 }
 0x624   : > { %1848 = vst.msk [vmem:[#allocation5 + $0x18] sm:$0xff] %vm907_vm2, %v1841_v3  ;;  %v4054_v4 = vpop.f32.mrb[13].mxu1 }
 0x62b   : > { %v5300_v5 = vpop.f32.mrb[14].mxu1 }
 0x62c   : > { %v5302_v6 = vpop.f32.mrb[15].mxu1 }
 0x675   : > { %v2070_v7 = vpop.permute.xlu1 %2069 }
 0x676   : > { %v2068_v8 = vpop.permute.xlu0 %2067 }
 0x679   : > { %v2076_v9 = vpop.permute.xlu1 %2075 }
 0x67a   : > { %v2074_v40 = vpop.permute.xlu0 %2073  ;;  %v2153_v11 = vcombine.low %v4065_v35, %v2076_v9  ;;  %v2154_v12 = vcombine.high %v4065_v35, %v2076_v9 }
 0x67b   : > { %v2085_v13 = vcombine.low %v1973_v2, %v2074_v40  ;;  %v2086_v14 = vcombine.high %v1973_v2, %v2074_v40 }
 0x67c   : > { %v2161_v25 = vrot.slane %v2153_v11, %v5132_v56  ;;  %v2168_v26 = vrot.slane %v2154_v12, %v5132_v56 }
 0x67d   : > { %v2082_v16 = vpop.permute.xlu1 %2081  ;;  %v2093_v42 = vrot.slane %v2085_v13, %v5132_v56  ;;  %v2100_v30 = vrot.slane %v2086_v14, %v5132_v56 }
 0x67e   : > { %v2169_v17 = vcombine.low %v2070_v7, %v2082_v16  ;;  %v2170_v19 = vcombine.high %v2070_v7, %v2082_v16  ;;  %v2080_v21 = vpop.permute.xlu0 %2079 }
 0x67f   : > { %v2101_v22 = vcombine.low %v2068_v8, %v2080_v21  ;;  %v2102_v24 = vcombine.high %v2068_v8, %v2080_v21 }
 0x680   : > { %v2177_v27 = vrot.slane %v2169_v17, %v5132_v56  ;;  %v2184_v29 = vrot.slane %v2170_v19, %v5132_v56 }
 0x681   : > { %v2109_v32 = vrot.slane %v2101_v22, %v5132_v56  ;;  %v2116_v33 = vrot.slane %v2102_v24, %v5132_v56 }
 0x682   : > { %v2185_v34 = vcombine.low %v2161_v25, %v2177_v27  ;;  %v2186_v44 = vcombine.high %v2161_v25, %v2177_v27  ;;  %v2201_v37 = vcombine.low %v2168_v26, %v2184_v29  ;;  %v2202_v38 = vcombine.high %v2168_v26, %v2184_v29 }
 0x683   : > { %v2117_v39 = vcombine.low %v2093_v42, %v2109_v32  ;;  %v2118_v41 = vcombine.high %v2093_v42, %v2109_v32  ;;  %v2133_v45 = vcombine.low %v2100_v30, %v2116_v33  ;;  %v2134_v46 = vcombine.high %v2100_v30, %v2116_v33 }
 0x684   : > { %v2193_v47 = vrot.slane %v2185_v34, %v5134_v62  ;;  %v2200_v48 = vrot.slane %v2186_v44, %v5134_v62  ;;  %v2209_v50 = vrot.slane %v2201_v37, %v5134_v62  ;;  %v2216_v51 = vrot.slane %v2202_v38, %v5134_v62 }
 0x685   : > { %v2125_v28 = vrot.slane %v2117_v39, %v5134_v62  ;;  %v2132_v52 = vrot.slane %v2118_v41, %v5134_v62  ;;  %v2141_v54 = vrot.slane %v2133_v45, %v5134_v62  ;;  %v2148_v55 = vrot.slane %v2134_v46, %v5134_v62  ;;  %v2061_v45 = vld [vmem:[#allocation2] sm:$0xff]  ;;  %v2062_v46 = vld [vmem:[#allocation2 + $0x8] sm:$0xff] }
 0x686   : > { %v2289_v57 = vcombine.low %v2193_v47, %v2200_v48  ;;  %v3880_v23 = vcombine.high %v2193_v47, %v2200_v48  ;;  %v2305_v58 = vcombine.low %v2209_v50, %v2216_v51  ;;  %v3881_v59 = vcombine.high %v2209_v50, %v2216_v51  ;;  %v2063_v47 = vld [vmem:[#allocation2 + $0x10] sm:$0xff]  ;;  %v2064_v48 = vld [vmem:[#allocation2 + $0x18] sm:$0xff] }
 0x687   : > { %v2221_v15 = vcombine.low %v2125_v28, %v2132_v52  ;;  %v3878_v60 = vcombine.high %v2125_v28, %v2132_v52  ;;  %v2237_v20 = vcombine.low %v2141_v54, %v2148_v55  ;;  %v3879_v43 = vcombine.high %v2141_v54, %v2148_v55 }
 0x688   : > { %v2296_v31 = vrot.slane %v2289_v57, %v5132_v56  ;;  %v2304_v63 = vrot.slane %v3880_v23, %v5132_v56  ;;  %v2312_v0 = vrot.slane %v2305_v58, %v5132_v56  ;;  %v2320_v1 = vrot.slane %v3881_v59, %v5132_v56 }
 0x689   : > { %v2228_v35 = vrot.slane %v2221_v15, %v5132_v56  ;;  %v2236_v2 = vrot.slane %v3878_v60, %v5132_v56  ;;  %v2244_v3 = vrot.slane %v2237_v20, %v5132_v56  ;;  %v2252_v4 = vrot.slane %v3879_v43, %v5132_v56  ;;  %v5382_v43 = vld [vmem:[#allocation3 + $0x8] sm:$0xff] }
 0x68a   : > { %v2321_v7 = vcombine.low %v2296_v31, %v2304_v63  ;;  %v2322_v8 = vcombine.high %v2296_v31, %v2304_v63  ;;  %v2337_v9 = vcombine.low %v2312_v0, %v2320_v1  ;;  %v2338_v40 = vcombine.high %v2312_v0, %v2320_v1  ;;  %v5384_v63 = vld [vmem:[#allocation3] sm:$0xff] }
 0x68b   : > { %v2253_v11 = vcombine.low %v2228_v35, %v2236_v2  ;;  %v2254_v12 = vcombine.high %v2228_v35, %v2236_v2  ;;  %v2269_v13 = vcombine.low %v2244_v3, %v2252_v4  ;;  %v2270_v14 = vcombine.high %v2244_v3, %v2252_v4 }
 0x68c   : > { %v2329_v16 = vrot.slane %v2321_v7, %v5134_v62  ;;  %v2336_v17 = vrot.slane %v2322_v8, %v5134_v62  ;;  %v2345_v19 = vrot.slane %v2337_v9, %v5134_v62  ;;  %v2352_v21 = vrot.slane %v2338_v40, %v5134_v62  ;;  %v5402_v8 = vld [vmem:[#allocation3 + $0x10] sm:$0xff] }
 0x68d   : > { %v2261_v22 = vrot.slane %v2253_v11, %v5134_v62  ;;  %v2268_v24 = vrot.slane %v2254_v12, %v5134_v62  ;;  %v2277_v25 = vrot.slane %v2269_v13, %v5134_v62  ;;  %v2284_v26 = vrot.slane %v2270_v14, %v5134_v62  ;;  %v5412_v13 = vld [vmem:[#allocation3 + $0x18] sm:$0xff] }
 0x68e   : > { %v2353_v27 = vcombine.low %v2329_v16, %v2345_v19  ;;  %v2354_v29 = vcombine.high %v2329_v16, %v2345_v19  ;;  %v2355_v42 = vcombine.low %v2336_v17, %v2352_v21  ;;  %v2356_v30 = vcombine.high %v2336_v17, %v2352_v21 }
 0x68f   : > { %v2285_v32 = vcombine.low %v2261_v22, %v2277_v25  ;;  %v2286_v33 = vcombine.high %v2261_v22, %v2277_v25  ;;  %v2287_v34 = vcombine.low %v2268_v24, %v2284_v26  ;;  %v2288_v44 = vcombine.high %v2268_v24, %v2284_v26 }
 0x690   : > { %v4701_v20 = vmov 0  }
 0x691   : > { %v4179_v37 = vpack.c.bf16 %v2353_v27, %v2285_v32  ;;  %v4183_v38 = vpack.c.bf16 %v2354_v29, %v2286_v33  ;;  %v4187_v39 = vpack.c.bf16 %v2355_v42, %v2287_v34  ;;  %v4191_v41 = vpack.c.bf16 %v2356_v30, %v2288_v44  ;;  %4345 = vset.pattern.permute.xlu1 %v4701_v20 }
 0x692   : > { %4344 = vset.pattern.permute.xlu0 %v4701_v20 }
 0x693   : > { %4181 = vmatpush3.bf16.xpose.msk.msra.mxu0 %vm4180_vm4, %v4179_v37  ;;  %4185 = vmatpush3.bf16.xpose.msk.msra.mxu1 %vm4180_vm4, %v4183_v38 }
 0x694   : > { %4186 = vmatprep.subr.bf16.mxu0 %v4693_v10  ;;  %4190 = vmatprep.subr.bf16.mxu1 %v4693_v10 }
 0x69a   : > { %4082 = vmatmul.mubr.msk.f32.vlgmr.msra.gmra.mrb[10].mxu0 %vm907_vm2, %v2061_v45  ;;  %4089 = vmatmul.mubr.msk.f32.vlgmr.msra.gmra.mrb[16].mxu1 %vm907_vm2, %v2062_v46 }
 0x69b   : > { %4189 = vmatpush3.bf16.xpose.msk.msra.mxu0 %vm4180_vm4, %v4187_v39  ;;  %4193 = vmatpush3.bf16.xpose.msk.msra.mxu1 %vm4180_vm4, %v4191_v41 }
 0x69c   : > { %4095 = vmatprep.mubr.msk.f32.mxu0 %vm4694_vm1, %v4695_v18  ;;  %4102 = vmatprep.mubr.msk.f32.mxu1 %vm4694_vm1, %v4695_v18 }
 0x69d   : > { %4194 = vmatprep.subr.bf16.mxu0 %v4693_v10  ;;  %4197 = vmatprep.subr.bf16.mxu1 %v4693_v10 }
 0x6a2   : > { %4096 = vmatmul.mubr.msk.f32.vlgmr.msra.gmra.mrb[12].mxu0 %vm907_vm2, %v2063_v47  ;;  %4103 = vmatmul.mubr.msk.f32.vlgmr.msra.gmra.mrb[18].mxu1 %vm907_vm2, %v2064_v48 }
 0x6a3   : > { %4109 = vmatprep.mubr.msk.f32.mxu0 %vm4694_vm1, %v4695_v18  ;;  %4116 = vmatprep.mubr.msk.f32.mxu1 %vm4694_vm1, %v4695_v18 }
 0x76d   : > { %v5354_v50 = vpop.f32.mrb[10].mxu0  ;;  %v5356_v51 = vpop.f32.mrb[16].mxu1 }
 0x76e   : > { %v4083_v28 = vpop.f32.mrb[11].mxu0  ;;  %v4090_v52 = vpop.f32.mrb[17].mxu1  ;;  %v2682_v54 = vsel %vm2678_vm5, %v5356_v51, -inf  ;;  %v2679_v55 = vsel %vm2678_vm5, %v5354_v50, -inf }
 0x76f   : > { %2683 = vmax.xlane.f32.xlu1 %v2682_v54  ;;  %2680 = vmax.xlane.f32.xlu0 %v2679_v55 }
 0x775   : > { %v5362_v57 = vpop.f32.mrb[12].mxu0  ;;  %v5364_v23 = vpop.f32.mrb[18].mxu1 }
 0x776   : > { %v4097_v58 = vpop.f32.mrb[13].mxu0  ;;  %v4104_v59 = vpop.f32.mrb[19].mxu1  ;;  %v2685_v15 = vsel %vm2678_vm5, %v5362_v57, -inf  ;;  %v2688_v60 = vsel %vm2678_vm5, %v5364_v23, -inf }
 0x777   : > { %2686 = vmax.xlane.f32.xlu0 %v2685_v15 }
 0x77b   : > { %2689 = vmax.xlane.f32.xlu0 %v2688_v60 }
 0x780   : > { %2798 = vrot.lane.b32.xlu1 %v5302_v6, %s4697_s28 }
 0x784   : > { %2804 = vrot.lane.b32.xlu1 %v5302_v6, %s4698_s22 }
 0x788   : > { %2806 = vrot.lane.b32.xlu1 %v5300_v5, %s4698_s22  ;;  %s4704_s22 = smov 24  }
 0x78c   : > { %2812 = vrot.lane.b32.xlu1 %v5300_v5, %s4696_s19 }
 0x791   : > { %2800 = vrot.lane.b32.xlu0 %v5300_v5, %s4697_s28  ;;  %s4703_s28 = smov 8  }
 0x795   : > { %2810 = vrot.lane.b32.xlu0 %v5302_v6, %s4696_s19  ;;  %s4702_s19 = smov 16  }
 0x7fc   : > { %v2684_v31 = vpop.xlane.xlu1 %2683  ;;  %v2681_v0 = vpop.xlane.xlu0 %2680 }
 0x7fd   : > { %v5387_v1 = vmax.f32 %v5382_v43, %v2684_v31  ;;  %v5390_v35 = vmax.f32 %v5384_v63, %v2681_v0 }
 0x7ff   : > { %v2696_v2 = vsub.f32 %v5382_v43, %v5387_v1  ;;  %3389 = vst.msk [vmem:[#allocation3 + $0x8] sm:$0xff] %vm1386_vm3, %v5387_v1  ;;  %v2695_v3 = vsub.f32 %v5384_v63, %v5390_v35  ;;  %3388 = vst.msk [vmem:[#allocation3] sm:$0xff] %vm1386_vm3, %v5390_v35  ;;  %2714 = vperm.xlu1 %4345, %v5387_v1   ;;  %2709 = vperm.xlu0 %4344, %v5390_v35  }
 0x800   : > { %v2799_v4 = vpop.permute.xlu1 %2798 }
 0x804   : > { %v2805_v7 = vpop.permute.xlu1 %2804  ;;  %v2687_v9 = vpop.xlane.xlu0 %2686 }
 0x805   : > { %v5405_v40 = vmax.f32 %v5402_v8, %v2687_v9  ;;  %v2816_v30 = vcombine.low %v5302_v6, %v2805_v7  ;;  %v2817_v32 = vcombine.high %v5302_v6, %v2805_v7 }
 0x807   : > { %v2697_v11 = vsub.f32 %v5402_v8, %v5405_v40  ;;  %3390 = vst.msk [vmem:[#allocation3 + $0x10] sm:$0xff] %vm1386_vm3, %v5405_v40  ;;  %2719 = vperm.xlu1 %4345, %v5405_v40   ;;  %v2824_v28 = vrot.slane %v2816_v30, %v5132_v56  ;;  %v2831_v52 = vrot.slane %v2817_v32, %v5132_v56 }
 0x808   : > { %v2807_v12 = vpop.permute.xlu1 %2806  ;;  %v2690_v14 = vpop.xlane.xlu0 %2689 }
 0x809   : > { %v5415_v16 = vmax.f32 %v5412_v13, %v2690_v14  ;;  %v2884_v17 = vcombine.low %v5300_v5, %v2807_v12  ;;  %v2885_v19 = vcombine.high %v5300_v5, %v2807_v12 }
 0x80b   : > { %v2698_v21 = vsub.f32 %v5412_v13, %v5415_v16  ;;  %3391 = vst.msk [vmem:[#allocation3 + $0x18] sm:$0xff] %vm1386_vm3, %v5415_v16  ;;  %2724 = vperm.xlu0 %4344, %v5415_v16   ;;  %v2892_v27 = vrot.slane %v2884_v17, %v5132_v56  ;;  %v2899_v29 = vrot.slane %v2885_v19, %v5132_v56 }
 0x80c   : > { %v2813_v22 = vpop.permute.xlu1 %2812  ;;  %v2801_v24 = vpop.permute.xlu0 %2800 }
 0x80d   : > { %v2900_v25 = vcombine.low %v2801_v24, %v2813_v22  ;;  %v2901_v26 = vcombine.high %v2801_v24, %v2813_v22 }
 0x80f   : > { %v2908_v42 = vrot.slane %v2900_v25, %v5132_v56  ;;  %v2915_v5 = vrot.slane %v2901_v26, %v5132_v56 }
 0x810   : > { %v2811_v33 = vpop.permute.xlu0 %2810 }
 0x811   : > { %v2916_v34 = vcombine.low %v2892_v27, %v2908_v42  ;;  %v2917_v44 = vcombine.high %v2892_v27, %v2908_v42  ;;  %v2932_v37 = vcombine.low %v2899_v29, %v2915_v5  ;;  %v2933_v38 = vcombine.high %v2899_v29, %v2915_v5 }
 0x812   : > { %v2832_v39 = vcombine.low %v2799_v4, %v2811_v33  ;;  %v2833_v41 = vcombine.high %v2799_v4, %v2811_v33 }
 0x813   : > { %v2924_v45 = vrot.slane %v2916_v34, %v5134_v62  ;;  %v2931_v46 = vrot.slane %v2917_v44, %v5134_v62  ;;  %v2940_v47 = vrot.slane %v2932_v37, %v5134_v62  ;;  %v2947_v48 = vrot.slane %v2933_v38, %v5134_v62 }
 0x814   : > { %v2840_v6 = vrot.slane %v2832_v39, %v5132_v56  ;;  %v2847_v54 = vrot.slane %v2833_v41, %v5132_v56 }
 0x815   : > { %v3020_v55 = vcombine.low %v2924_v45, %v2931_v46  ;;  %v3896_v58 = vcombine.high %v2924_v45, %v2931_v46  ;;  %v3036_v59 = vcombine.low %v2940_v47, %v2947_v48  ;;  %v3897_v15 = vcombine.high %v2940_v47, %v2947_v48 }
 0x816   : > { %v2848_v60 = vcombine.low %v2824_v28, %v2840_v6  ;;  %v2849_v20 = vcombine.high %v2824_v28, %v2840_v6  ;;  %v2864_v31 = vcombine.low %v2831_v52, %v2847_v54  ;;  %v2865_v0 = vcombine.high %v2831_v52, %v2847_v54 }
 0x817   : > { %v3027_v4 = vrot.slane %v3020_v55, %v5132_v56  ;;  %v3035_v7 = vrot.slane %v3896_v58, %v5132_v56  ;;  %v3043_v9 = vrot.slane %v3036_v59, %v5132_v56  ;;  %v3051_v12 = vrot.slane %v3897_v15, %v5132_v56 }
 0x818   : > { %v2856_v14 = vrot.slane %v2848_v60, %v5134_v62  ;;  %v2863_v17 = vrot.slane %v2849_v20, %v5134_v62  ;;  %v2872_v19 = vrot.slane %v2864_v31, %v5134_v62  ;;  %v2879_v22 = vrot.slane %v2865_v0, %v5134_v62 }
 0x819   : > { %v3052_v24 = vcombine.low %v3027_v4, %v3035_v7  ;;  %v3068_v25 = vcombine.low %v3043_v9, %v3051_v12  ;;  %v3053_v26 = vcombine.high %v3027_v4, %v3035_v7  ;;  %v3069_v27 = vcombine.high %v3043_v9, %v3051_v12 }
 0x81a   : > { %v2952_v29 = vcombine.low %v2856_v14, %v2863_v17  ;;  %v3894_v42 = vcombine.high %v2856_v14, %v2863_v17  ;;  %v2968_v5 = vcombine.low %v2872_v19, %v2879_v22  ;;  %v3895_v30 = vcombine.high %v2872_v19, %v2879_v22 }
 0x81b   : > { %v3067_v32 = vrot.slane %v3053_v26, %v5134_v62  ;;  %v3083_v33 = vrot.slane %v3069_v27, %v5134_v62  ;;  %v3060_v39 = vrot.slane %v3052_v24, %v5134_v62  ;;  %v3076_v41 = vrot.slane %v3068_v25, %v5134_v62 }
 0x81c   : > { %v2959_v34 = vrot.slane %v2952_v29, %v5132_v56  ;;  %v2967_v44 = vrot.slane %v3894_v42, %v5132_v56  ;;  %v2975_v37 = vrot.slane %v2968_v5, %v5132_v56  ;;  %v2983_v38 = vrot.slane %v3895_v30, %v5132_v56 }
 0x81d   : > { %v3086_v45 = vcombine.low %v3067_v32, %v3083_v33  ;;  %v3087_v46 = vcombine.high %v3067_v32, %v3083_v33  ;;  %v3084_v59 = vcombine.low %v3060_v39, %v3076_v41  ;;  %v3085_v15 = vcombine.high %v3060_v39, %v3076_v41 }
 0x81e   : > { %v2984_v47 = vcombine.low %v2959_v34, %v2967_v44  ;;  %v3000_v48 = vcombine.low %v2975_v37, %v2983_v38  ;;  %v2985_v28 = vcombine.high %v2959_v34, %v2967_v44  ;;  %v3001_v52 = vcombine.high %v2975_v37, %v2983_v38 }
 0x81f   : > { %v1394_v14 = vsel %vm907_vm2, %v5243_v49, 0.0  ;;  %v1391_v17 = vsel %vm907_vm2, %v5239_v36, 0.0  ;;  %v1397_v19 = vsel %vm907_vm2, %v5254_v53, 0.0  ;;  %v1400_v22 = vsel %vm907_vm2, %v5278_v61, 0.0 }
 0x820   : > { %v2992_v6 = vrot.slane %v2984_v47, %v5134_v62  ;;  %v3008_v54 = vrot.slane %v3000_v48, %v5134_v62  ;;  %v2999_v55 = vrot.slane %v2985_v28, %v5134_v62  ;;  %v3015_v58 = vrot.slane %v3001_v52, %v5134_v62 }
 0x821   : > { %v2701_v37 = vmul.f32 1.442695, %v2696_v2  ;;  %v2699_v38 = vmul.f32 1.442695, %v2695_v3  ;;  %v2703_v39 = vmul.f32 1.442695, %v2697_v11 }
 0x822   : > { %v3016_v60 = vcombine.low %v2992_v6, %v3008_v54  ;;  %v3017_v20 = vcombine.high %v2992_v6, %v3008_v54  ;;  %v3018_v31 = vcombine.low %v2999_v55, %v3015_v58  ;;  %v3019_v0 = vcombine.high %v2999_v55, %v3015_v58 }
 0x824   : > { %v4195_v4 = vpack.c.bf16 %v3084_v59, %v3016_v60  ;;  %v4198_v7 = vpack.c.bf16 %v3085_v15, %v3017_v20  ;;  %v4201_v9 = vpack.c.bf16 %v3086_v45, %v3018_v31  ;;  %v4204_v12 = vpack.c.bf16 %v3087_v46, %v3019_v0 }
 0x826   : > { %4196 = vmatpush3.bf16.msra.mxu0 %v4195_v4  ;;  %4199 = vmatpush3.bf16.msra.mxu1 %v4198_v7 }
 0x827   : > { %4200 = vmatprep.subr.bf16.mxu0 %v4693_v10  ;;  %4203 = vmatprep.subr.bf16.mxu1 %v4693_v10 }
 0x82a   : > { %1395 = vadd.xlane.f32.xlu0 %v1394_v14  ;;  %v3584_v14 = vld [vmem:[%s5655_s3 + $0x8] sm:$0xff] }
 0x82b   : > { %1392 = vadd.xlane.f32.xlu1 %v1391_v17 }
 0x82e   : > { %1398 = vadd.xlane.f32.xlu0 %v1397_v19 }
 0x82f   : > { %1401 = vadd.xlane.f32.xlu1 %v1400_v22 }
 0x87e   : > { %v2715_v24 = vpop.permute.xlu1 %2714  ;;  %v2710_v25 = vpop.permute.xlu0 %2709 }
 0x87f   : > { %v2728_v26 = vsub.f32 %v5356_v51, %v2715_v24  ;;  %v2727_v27 = vsub.f32 %v5354_v50, %v2710_v25  ;;  %v2769_v24 = vld [vmem:[#allocation5 + $0x8] sm:$0xff] }
 0x881   : > { %v2733_v49 = vmul.f32 1.442695, %v2728_v26  ;;  %v2731_v29 = vmul.f32 1.442695, %v2727_v27  ;;  %v2768_v26 = vld [vmem:[#allocation5] sm:$0xff] }
 0x883   : > { %4360 = vpow2.f32 %v2733_v49 }
 0x884   : > { %4362 = vpow2.f32 %v2731_v29 }
 0x886   : > { %v2720_v36 = vpop.permute.xlu1 %2719 }
 0x887   : > { %v2729_v42 = vsub.f32 %v5362_v57, %v2720_v36 }
 0x889   : > { %v2735_v5 = vmul.f32 1.442695, %v2729_v42 }
 0x88a   : > { %v2725_v53 = vpop.permute.xlu0 %2724 }
 0x88b   : > { %4364 = vpow2.f32 %v2735_v5  ;;  %v2730_v30 = vsub.f32 %v5364_v23, %v2725_v53 }
 0x88d   : > { %v4361_v61 = vpop.eup %4360  ;;  %v2737_v32 = vmul.f32 1.442695, %v2730_v30 }
 0x88e   : > { %v4363_v33 = vpop.eup %4362  ;;  %4117 = vmatmul.mubr.msk.f32.vlgmr.msra.gmra.mrb[20].mxu1 %vm2678_vm5, %v4361_v61  ;;  %v2750_v51 = vsel %vm2678_vm5, %v4361_v61, 0.0  ;;  %v2770_v61 = vld [vmem:[#allocation5 + $0x10] sm:$0xff] }
 0x88f   : > { %4366 = vpow2.f32 %v2737_v32  ;;  %4110 = vmatmul.mubr.msk.f32.vlgmr.msra.gmra.mrb[14].mxu0 %vm2678_vm5, %v4363_v33  ;;  %4205 = vmatpush3.bf16.msra.mxu1 %v4204_v12  ;;  %v2747_v50 = vsel %vm2678_vm5, %v4363_v33, 0.0  ;;  %v3583_v12 = vld [vmem:[%s5655_s3] sm:$0xff] }
 0x890   : > { %4202 = vmatpush3.bf16.msra.mxu0 %v4201_v9  ;;  %2751 = vadd.xlane.f32.xlu1 %v2750_v51  ;;  %4368 = vpow2.f32 %v2701_v37  ;;  %v4207_v17 = vpack.c.bf16 %v3584_v14, %v3583_v12 }
 0x891   : > { %2748 = vadd.xlane.f32.xlu0 %v2747_v50  ;;  %4123 = vmatprep.mubr.msk.f32.mxu0 %vm4694_vm1, %v4695_v18  ;;  %4370 = vpow2.f32 %v2699_v38 }
 0x892   : > { %4130 = vmatprep.mubr.msk.f32.mxu1 %vm4694_vm1, %v4695_v18  ;;  %4206 = vmatprep.subr.bf16.mxu0 %v4693_v10  ;;  %4372 = vpow2.f32 %v2703_v39 }
 0x895   : > { %v4365_v57 = vpop.eup %4364 }
 0x896   : > { %4124 = vmatmul.mubr.msk.f32.vlgmr.msra.gmra.mrb[16].mxu0 %vm2678_vm5, %v4365_v57  ;;  %v2753_v23 = vsel %vm2678_vm5, %v4365_v57, 0.0  ;;  %v2771_v57 = vld [vmem:[#allocation5 + $0x18] sm:$0xff] }
 0x897   : > { %2754 = vadd.xlane.f32.xlu0 %v2753_v23  ;;  %4141 = vmatprep.mubr.msk.f32.mxu0 %vm4694_vm1, %v4695_v18  ;;  %v2705_v18 = vmul.f32 1.442695, %v2698_v21 }
 0x898   : > { %4208 = vmatpush3.bf16.msra.mxu0 %v4207_v17 }
 0x899   : > { %v4367_v34 = vpop.eup %4366  ;;  %4374 = vpow2.f32 %v2705_v18  ;;  %4209 = vmatprep.subr.bf16.mxu0 %v4693_v10 }
 0x89a   : > { %4131 = vmatmul.mubr.msk.f32.vlgmr.msra.gmra.mrb[22].mxu1 %vm2678_vm5, %v4367_v34  ;;  %v2756_v44 = vsel %vm2678_vm5, %v4367_v34, 0.0  ;;  %v4369_v41 = vpop.eup %4368 }
 0x89b   : > { %2757 = vadd.xlane.f32.xlu1 %v2756_v44  ;;  %v4371_v45 = vpop.eup %4370 }
 0x89c   : > { %v4373_v43 = vpop.eup %4372 }
 0x8a3   : > { %v4375_v1 = vpop.eup %4374 }
 0x8ac   : > { %2779 = vperm.xlu1 %4345, %v4369_v41  }
 0x8ad   : > { %2774 = vperm.xlu0 %4344, %v4371_v45  }
 0x8b0   : > { %2784 = vperm.xlu1 %4345, %v4373_v43  }
 0x8b1   : > { %2789 = vperm.xlu0 %4344, %v4375_v1  }
 0x8b7   : > { %v1396_v63 = vpop.xlane.xlu0 %1395 }
 0x8b8   : > { %1404 = vst.msk [vmem:[#allocation4 + $0x8] sm:$0xff] %vm1386_vm3, %v1396_v63  ;;  %v1393_v35 = vpop.xlane.xlu1 %1392 }
 0x8b9   : > { %1403 = vst.msk [vmem:[#allocation4] sm:$0xff] %vm1386_vm3, %v1393_v35 }
 0x8bb   : > { %v1399_v2 = vpop.xlane.xlu0 %1398 }
 0x8bc   : > { %1405 = vst.msk [vmem:[#allocation4 + $0x10] sm:$0xff] %vm1386_vm3, %v1399_v2  ;;  %v1402_v3 = vpop.xlane.xlu1 %1401 }
 0x8bd   : > { %1406 = vst.msk [vmem:[#allocation4 + $0x18] sm:$0xff] %vm1386_vm3, %v1402_v3 }
 0x8bf   : > { %v2740_v8 = vld [vmem:[#allocation4 + $0x8] sm:$0xff] }
 0x8c0   : > { %v2739_v40 = vld [vmem:[#allocation4] sm:$0xff]  ;;  %v2744_v11 = vmul.f32 %v4369_v41, %v2740_v8 }
 0x8c1   : > { %v2743_v16 = vmul.f32 %v4371_v45, %v2739_v40 }
 0x8c3   : > { %v2741_v48 = vld [vmem:[#allocation4 + $0x10] sm:$0xff] }
 0x8c4   : > { %v2745_v28 = vmul.f32 %v4373_v43, %v2741_v48  ;;  %v2742_v6 = vld [vmem:[#allocation4 + $0x18] sm:$0xff] }
 0x8c5   : > { %v2746_v55 = vmul.f32 %v4375_v1, %v2742_v6 }
 0x91d   : > { %v2752_v13 = vpop.xlane.xlu1 %2751 }
 0x91e   : > { %v2760_v21 = vadd.f32 %v2752_v13, %v2744_v11  ;;  %v2749_v46 = vpop.xlane.xlu0 %2748 }
 0x91f   : > { %v2759_v47 = vadd.f32 %v2749_v46, %v2743_v16 }
 0x920   : > { %2765 = vst.msk [vmem:[#allocation4 + $0x8] sm:$0xff] %vm1386_vm3, %v2760_v21 }
 0x921   : > { %2764 = vst.msk [vmem:[#allocation4] sm:$0xff] %vm1386_vm3, %v2759_v47 }
 0x924   : > { %v2755_v52 = vpop.xlane.xlu0 %2754 }
 0x925   : > { %v2761_v54 = vadd.f32 %v2755_v52, %v2745_v28 }
 0x927   : > { %2766 = vst.msk [vmem:[#allocation4 + $0x10] sm:$0xff] %vm1386_vm3, %v2761_v54  ;;  %v3400_v58 = vld [vmem:[#allocation4 + $0x8] sm:$0xff] }
 0x928   : > { %v2758_v59 = vpop.xlane.xlu1 %2757  ;;  %4376 = vrcp.f32 %v3400_v58  ;;  %v3399_v15 = vld [vmem:[#allocation4] sm:$0xff]  ;;  %v3586_v58 = vld [vmem:[%s5655_s3 + $0x18] sm:$0xff] }
 0x929   : > { %v2762_v60 = vadd.f32 %v2758_v59, %v2746_v55  ;;  %4378 = vrcp.f32 %v3399_v15  ;;  %v3585_v55 = vld [vmem:[%s5655_s3 + $0x10] sm:$0xff] }
 0x92b   : > { %2767 = vst.msk [vmem:[#allocation4 + $0x18] sm:$0xff] %vm1386_vm3, %v2762_v60 }
 0x92c   : > { %v2780_v19 = vpop.permute.xlu1 %2779  ;;  %v2775_v22 = vpop.permute.xlu0 %2774 }
 0x92d   : > { %v2793_v25 = vmul.f32 %v2780_v19, %v2769_v24  ;;  %v2792_v27 = vmul.f32 %v2775_v22, %v2768_v26 }
 0x92e   : > { %v3401_v20 = vld [vmem:[#allocation4 + $0x10] sm:$0xff] }
 0x92f   : > { %4380 = vrcp.f32 %v3401_v20 }
 0x930   : > { %v2785_v30 = vpop.permute.xlu1 %2784  ;;  %v2790_v10 = vpop.permute.xlu0 %2789 }
 0x931   : > { %v2794_v32 = vmul.f32 %v2785_v30, %v2770_v61  ;;  %v2795_v23 = vmul.f32 %v2790_v10, %v2771_v57 }
 0x932   : > { %v4377_v31 = vpop.eup %4376  ;;  %v3402_v0 = vld [vmem:[#allocation4 + $0x18] sm:$0xff] }
 0x933   : > { %v4379_v4 = vpop.eup %4378  ;;  %3414 = vperm.xlu0 %4344, %v4377_v31   ;;  %4382 = vrcp.f32 %v3402_v0  ;;  %v4210_v31 = vpack.c.bf16 %v3586_v58, %v3585_v55 }
 0x934   : > { %3409 = vperm.xlu1 %4345, %v4379_v4  }
 0x935   : > { %4211 = vmatpush3.bf16.msra.mxu0 %v4210_v31 }
 0x939   : > { %v4381_v7 = vpop.eup %4380 }
 0x93a   : > { %3419 = vperm.xlu1 %4345, %v4381_v7  }
 0x93d   : > { %v4383_v9 = vpop.eup %4382 }
 0x93e   : > { %3424 = vperm.xlu0 %4344, %v4383_v9  }
 0x961   : > { %v3230_v49 = vpop.f32.mrb[20].mxu1 }
 0x962   : > { %v3157_v29 = vpop.f32.mrb[14].mxu0  ;;  %v3381_v36 = vadd.f32 %v3230_v49, %v2793_v25  ;;  %v4118_v42 = vpop.f32.mrb[21].mxu1 }
 0x963   : > { %v3380_v5 = vadd.f32 %v3157_v29, %v2792_v27  ;;  %v4111_v53 = vpop.f32.mrb[15].mxu0 }
 0x964   : > { %3385 = vst.msk [vmem:[#allocation5 + $0x8] sm:$0xff] %vm907_vm2, %v3381_v36 }
 0x965   : > { %3384 = vst.msk [vmem:[#allocation5] sm:$0xff] %vm907_vm2, %v3380_v5 }
 0x969   : > { %v3303_v33 = vpop.f32.mrb[16].mxu0 }
 0x96a   : > { %v3382_v51 = vadd.f32 %v3303_v33, %v2794_v32  ;;  %v4125_v50 = vpop.f32.mrb[17].mxu0 }
 0x96b   : > { %v3396_v63 = vld [vmem:[#allocation5 + $0x8] sm:$0xff] }
 0x96c   : > { %3386 = vst.msk [vmem:[#allocation5 + $0x10] sm:$0xff] %vm907_vm2, %v3382_v51  ;;  %v3395_v43 = vld [vmem:[#allocation5] sm:$0xff] }
 0x96d   : > { %v3376_v34 = vpop.f32.mrb[22].mxu1 }
 0x96e   : > { %v3383_v44 = vadd.f32 %v3376_v34, %v2795_v23  ;;  %v4132_v37 = vpop.f32.mrb[23].mxu1 }
 0x970   : > { %3387 = vst.msk [vmem:[#allocation5 + $0x18] sm:$0xff] %vm907_vm2, %v3383_v44 }
 0x973   : > { %v3397_v41 = vld [vmem:[#allocation5 + $0x10] sm:$0xff] }
 0x977   : > { %v3398_v35 = vld [vmem:[#allocation5 + $0x18] sm:$0xff] }
 0x9b2   : > { %v3415_v39 = vpop.permute.xlu0 %3414 }
 0x9b3   : > { %v3410_v38 = vpop.permute.xlu1 %3409  ;;  %v3428_v3 = vmul.f32 %v3415_v39, %v3396_v63 }
 0x9b4   : > { %v3427_v1 = vmul.f32 %v3410_v38, %v3395_v43 }
 0x9b9   : > { %v3420_v18 = vpop.permute.xlu1 %3419 }
 0x9ba   : > { %v3429_v45 = vmul.f32 %v3420_v18, %v3397_v41 }
 0x9bc   : > { %v3431_v8 = vcombine.low %v3427_v1, %v3429_v45  ;;  %v3432_v40 = vcombine.high %v3427_v1, %v3429_v45 }
 0x9bd   : > { %v3425_v2 = vpop.permute.xlu0 %3424 }
 0x9be   : > { %v3430_v11 = vmul.f32 %v3425_v2, %v3398_v35  ;;  %v3439_v21 = vrot.slane %v3431_v8, %v5132_v56  ;;  %v3446_v46 = vrot.slane %v3432_v40, %v5132_v56 }
 0x9c0   : > { %v3447_v13 = vcombine.low %v3428_v3, %v3430_v11  ;;  %v3448_v16 = vcombine.high %v3428_v3, %v3430_v11 }
 0x9c2   : > { %v3455_v47 = vrot.slane %v3447_v13, %v5132_v56  ;;  %v3462_v48 = vrot.slane %v3448_v16, %v5132_v56 }
 0x9c4   : > { %v3463_v28 = vcombine.low %v3439_v21, %v3455_v47  ;;  %v3464_v52 = vcombine.high %v3439_v21, %v3455_v47  ;;  %v3479_v6 = vcombine.low %v3446_v46, %v3462_v48  ;;  %v3480_v54 = vcombine.high %v3446_v46, %v3462_v48 }
 0x9c6   : > { %v3471_v59 = vrot.slane %v3463_v28, %v5134_v62  ;;  %v3478_v15 = vrot.slane %v3464_v52, %v5134_v62  ;;  %v3487_v60 = vrot.slane %v3479_v6, %v5134_v62  ;;  %v3494_v20 = vrot.slane %v3480_v54, %v5134_v62 }
 0x9c8   : > { %v3499_v0 = vcombine.low %v3471_v59, %v3478_v15  ;;  %v3902_v4 = vcombine.high %v3471_v59, %v3478_v15  ;;  %v3515_v7 = vcombine.low %v3487_v60, %v3494_v20  ;;  %v3903_v9 = vcombine.high %v3487_v60, %v3494_v20 }
 0x9ca   : > { %v3506_v12 = vrot.slane %v3499_v0, %v5132_v56  ;;  %v3514_v14 = vrot.slane %v3902_v4, %v5132_v56  ;;  %v3522_v17 = vrot.slane %v3515_v7, %v5132_v56  ;;  %v3530_v19 = vrot.slane %v3903_v9, %v5132_v56 }
 0x9cc   : > { %v3532_v22 = vcombine.high %v3506_v12, %v3514_v14  ;;  %v3548_v24 = vcombine.high %v3522_v17, %v3530_v19  ;;  %v3531_v25 = vcombine.low %v3506_v12, %v3514_v14  ;;  %v3547_v26 = vcombine.low %v3522_v17, %v3530_v19 }
 0x9ce   : > { %v3546_v27 = vrot.slane %v3532_v22, %v5134_v62  ;;  %v3562_v49 = vrot.slane %v3548_v24, %v5134_v62  ;;  %v3539_v29 = vrot.slane %v3531_v25, %v5134_v62  ;;  %v3555_v36 = vrot.slane %v3547_v26, %v5134_v62 }
 0x9d0   : > { %v3565_v42 = vcombine.low %v3546_v27, %v3562_v49  ;;  %v3564_v5 = vcombine.high %v3539_v29, %v3555_v36  ;;  %v3563_v53 = vcombine.low %v3539_v29, %v3555_v36  ;;  %v3566_v56 = vcombine.high %v3546_v27, %v3562_v49 }
 0x9d2   : > { %3572 = vrot.lane.b32.xlu0 %v3565_v42, %s4702_s19  ;;  %3568 = vrot.lane.b32.xlu1 %v3564_v5, %s4703_s28 }
 0x9d6   : > { %3576 = vrot.lane.b32.xlu1 %v3566_v56, %s4704_s22 }
 0xa44   : > { %v3569_v30 = vpop.permute.xlu1 %3568  ;;  %v3573_v61 = vpop.permute.xlu0 %3572 }
 0xa45   : > { %v3579_v32 = vsel %vm907_vm2, %v3563_v53, %v3569_v30 }
 0xa46   : > { %v3580_v10 = vsel %vm2678_vm5, %v3579_v32, %v3573_v61 }
 0xa48   : > { %v3577_v62 = vpop.permute.xlu1 %3576 }
 0xa49   : > { %v3582_v33 = vsel %vm3581_vm6, %v3580_v10, %v3577_v62 }
 0xa4a   : > { %4142 = vmatmul.mubr.msk.f32.vlgmr.msra.gmra.mrb[18].mxu0 %vm507_vm0, %v3582_v33 }
 0xb1d   : > { %v3656_v51 = vpop.f32.mrb[18].mxu0 }
 0xb1e   : > { %3660 = vst.msk [vmem:[%s498_s25] sm:$0xff] %vm507_vm0, %v3656_v51  ;;  %v4143_v50 = vpop.f32.mrb[19].mxu0 }
 0xb1f   : > { %4597 = shalt.err (!%p4594_p6)
}
 0xb20   : > { %s4598_s8 = scalar_lea.hbm %s5549_s24, 128  ;;  %s4602_s27 = scalar_lea.hbm %s5657_s6, 256 }
 0xb21   : > { %p4599_p5 = scmp.ne.s32.totalorder %s5549_s24, %s4598_s8  ;;  %p4603_p8 = scmp.lt.u32.totalorder %s5549_s24, %s5657_s6 }
 0xb22   : > { %p4604_p9 = scmp.lt.u32.totalorder %s4602_s27, %s4598_s8  ;;  %p4606_p3 = scmp.lt.u32.totalorder %s4598_s8, %s5549_s24 }
 0xb23   : > { %p4600_p7 = pnand %p4599_p5, %p5658_p10 }
 0xb24   : > { %p4605_p1 = por %p4604_p9, %p4603_p8 }
 0xb25   : > { %p4601_p0 = pneg %p4600_p7 }
 0xb26   : > { %p4607_p13 = por %p4606_p3, %p4605_p1 }
 0xb28   : > { %p4608_p2 = pnand %p4607_p13, %p4601_p0 }
 0xb2a   : > { %4611 = shalt.err (!%p4608_p2)
}
 0xb2b   : > { %4236 = dma.vmem_to_hbm [thread:$0]  (%p5658_p10), %s5551_s29, 128, %s5549_s24, %s3662_s10  }
 0xb2c PF: > { %s3687_s22 = sand.u32 1, %s4662_s13   ;;  %p5659_p11 = scmp.ne.s32.totalorder %s5640_s11, 0 }
 0xb2d   : > { %p5660_p12 = scmp.ge.s32.totalorder %s4682_s18, 2  ;;  %s3688_s23 = scalar_lea.sflag [#allocation8], %s3687_s22 }
 0xb2f   : > { %p4262_p4 = pnand %p5660_p12, %p5659_p11 }
 0xb31   : > { %4657 = dma.done.wait (!%p4262_p4), %s3688_s23, 128  }
 0xb32   : > { %4659 = vsyncadd (!%p4262_p4), %s3688_s23, 4294967168  ;;  %s31_s18 = sadd.s32 1, %s4682_s18   ;;  %s5661_s13 = smov %s4666_s14 }
 0xb33   : > { %p28_p6 = scmp.ge.s32.totalorder %s31_s18, 4   ;;  %s5662_s14 = smov %s4670_s15 }
 0xb34   : > { %s5663_s15 = smov %s4955_s9  ;;  %s5664_s16 = smov %s4678_s17 }
 0xb35   : > { %s5665_s17 = smov %s5667_s21  ;;  %30 = sbr.rel (!%p28_p6) target bundleno = 20 (0x14), region = 146 }
 0xb3c   :  { %3693 = vsyncpa [#allocation7], 1 }
 0xb3d   :  { %3695 = vsyncpa [#allocation7 + $0x1], 1 }
 0xb3e   :  { %3696 = vsyncpa [#allocation10], 1 }
 0xb3f   :  { %3698 = vsyncpa [#allocation10 + $0x1], 1 }
 0xb40   :  { %3699 = vsyncpa [#allocation13], 1 }
 0xb41   :  { %3700 = vsyncpa [#allocation16], 1 }
 0xb42   :  { %3701 = vsyncpa [#allocation8], 1 }
 0xb43   :  { %3703 = vsyncpa [#allocation8 + $0x1], 1 }

</bundles_post_ra>
